<compile_context>
chip_gen: v7x
topology: tpu7x:2x2x1
jax: 0.10.0
libtpu: 0.0.40
codegen_flags: <defaults>
</compile_context>

<pallas_src>
import functools

import jax
import jax.numpy as jnp
from jax.experimental import pallas as pl
from jax.experimental.pallas import tpu as pltpu


# ---------------------------------------------------------------------------
# Wrapper-side glue: pad=1 + conv1 (k=4, s=2) im2col, grouped by the parity of
# the conv1 output row/col so that the kernel can scatter conv1's result into
# conv2's parity-split padded layout with 4 contiguous block stores.
#   returns bf16 [4, B*A2*A2, 16*C]
#     axis0: parity group g = 2*(out_row % 2) + (out_col % 2)
#     axis1: (b, out_row // 2, out_col // 2)
#     axis2: (tap = kh*4 + kw, in_channel)
# ---------------------------------------------------------------------------
def _prep_conv1_patches(img):
    B, C, H, W = img.shape
    A2 = H // 4
    xpad = jnp.pad(img, ((0, 0), (0, 0), (1, 1), (1, 1))).transpose(0, 2, 3, 1)
    taps = [xpad[:, i:i + H:2, j:j + W:2, :]              # [B, H//2, W//2, C]
            for i in range(4) for j in range(4)]
    p = jnp.stack(taps, axis=3)                           # [B, A1, A1, 16, C]
    p = p.reshape(B, A2, 2, A2, 2, 16, C)                 # rows->(u,rho), cols->(v,gam)
    p = p.transpose(2, 4, 0, 1, 3, 5, 6)                  # [rho, gam, B, u, v, 16, C]
    return p.reshape(4, B * A2 * A2, 16 * C).astype(jnp.bfloat16)


# conv2 tap index (0..3) -> (parity group of the conv1-output row/col it reads,
#                            slice start inside the zero-padded parity group)
_TAP_PAR = (1, 0, 1, 0)
_TAP_OFF = (0, 1, 1, 2)


# ---------------------------------------------------------------------------
# Fused critic kernel: conv1+LReLU -> conv2+LReLU -> linear (VPU reduce).
# All intermediate activations stay in VMEM.
# ---------------------------------------------------------------------------
def _critic_kernel(p1_ref, w1_ref, b1_ref, w2_ref, b2_ref, w3_ref, b3_ref,
                   out_ref, s_ref, p2_ref, *, slope):
    TB = out_ref.shape[0]                 # batch tile
    C1 = w1_ref.shape[1]
    A2 = s_ref.shape[3] - 2               # conv2 output spatial size
    M = A2 * A2

    # ---- conv1: ONE fused GEMM over all 4 parity groups x whole batch tile ----
    p1 = p1_ref[...].reshape(4 * TB * M, p1_ref.shape[2])           # bf16
    h1 = jnp.dot(p1, w1_ref[...], preferred_element_type=jnp.float32)
    h1 = h1 + b1_ref[...]
    h1 = jnp.where(h1 > 0, h1, slope * h1).astype(jnp.bfloat16)     # [4*TB*M, C1]

    # Zero-padded, parity-split conv2 input (the zeros are conv2's pad=1 border).
    # Only the 1-wide border is semantically needed; a full fill is a handful of
    # unmasked vreg stores and simpler than 4 masked border writes.
    s_ref[...] = jnp.zeros_like(s_ref)
    for g in range(4):                     # 4 contiguous block stores
        rho, gam = g // 2, g % 2
        blk = h1[g * TB * M:(g + 1) * TB * M, :].reshape(TB, A2, A2, C1)
        s_ref[rho, gam, :, 1:1 + A2, 1:1 + A2, :] = blk

    # ---- conv2 im2col: 16 contiguous slab copies (lane width = C1 = 64) ----
    for i2 in range(4):
        ri, oi = _TAP_PAR[i2], _TAP_OFF[i2]
        for j2 in range(4):
            rj, oj = _TAP_PAR[j2], _TAP_OFF[j2]
            slab = s_ref[ri, rj, :, oi:oi + A2, oj:oj + A2, :]      # [TB, A2, A2, C1]
            k0 = (i2 * 4 + j2) * C1
            p2_ref[:, k0:k0 + C1] = slab.reshape(TB * M, C1)

    # ---- conv2: ONE GEMM for the whole batch tile + f32 epilogue ----
    y2 = jnp.dot(p2_ref[...], w2_ref[...], preferred_element_type=jnp.float32)
    y2 = y2 + b2_ref[...]
    y2 = jnp.where(y2 > 0, y2, slope * y2)                          # [TB*M, C2] f32

    # ---- final Linear(->1): VPU multiply + lane reductions, ONE output store ----
    prod = y2.reshape(TB, M, y2.shape[1]) * w3_ref[...]             # bcast over TB
    part = jnp.sum(prod, axis=-1)                                   # [TB, M]
    score = jnp.sum(part, axis=-1, keepdims=True)                   # [TB, 1]
    out_ref[...] = score + b3_ref[...]


@functools.partial(jax.jit, static_argnames=("slope",))
def _critic_forward(img, w1, b1, w2, b2, w3, b3, *, slope=0.2):
    B, C, H, W = img.shape
    assert H == W and H % 4 == 0, "img_size must be square and divisible by 4"
    A2 = H // 4
    M = A2 * A2
    C1 = w1.shape[1]

    # Batch tile: one grid step per TB images -> "parallel" axis (v7x megacore,
    # BlockSpec pipelining) and per-tile (not per-batch) scratch.
    TB = B if B <= 8 else 8
    assert B % TB == 0, "batch must be <= 8 or a multiple of 8"

    p1 = _prep_conv1_patches(img)                       # [4, B*M, 16*C] bf16
    kernel = functools.partial(_critic_kernel, slope=slope)

    return pl.pallas_call(
        kernel,
        out_shape=jax.ShapeDtypeStruct((B, 1), jnp.float32),
        grid=(B // TB,),
        in_specs=[
            pl.BlockSpec((4, TB * M, 16 * C), lambda i: (0, i, 0)),
            pl.BlockSpec(w1.shape, lambda i: (0, 0)),
            pl.BlockSpec(b1.shape, lambda i: (0, 0)),
            pl.BlockSpec(w2.shape, lambda i: (0, 0)),
            pl.BlockSpec(b2.shape, lambda i: (0, 0)),
            pl.BlockSpec(w3.shape, lambda i: (0, 0)),
            pl.BlockSpec(b3.shape, lambda i: (0, 0)),
        ],
        out_specs=pl.BlockSpec((TB, 1), lambda i: (i, 0)),
        scratch_shapes=[
            pltpu.VMEM((2, 2, TB, A2 + 2, A2 + 2, C1), jnp.bfloat16),  # parity-split conv2 input
            pltpu.VMEM((TB * M, 16 * C1), jnp.bfloat16),               # conv2 im2col
        ],
        compiler_params=pltpu.CompilerParams(
            dimension_semantics=("parallel",)),
    )(p1, w1, b1, w2, b2, w3, b3)


# ---------------------------------------------------------------------------
# Modules (mirror the torch wrapper: pick a sub-module by name)
# ---------------------------------------------------------------------------
class CovDiscriminator:
    """Conv critic: Conv(4,s2,p1)+LReLU -> Conv(4,s2,p1)+LReLU -> Linear(1).

    Weights are created once, directly in GEMM-ready layouts:
      w1: [16*IC, C1]  rows = (kh*4+kw)*IC + ic, bf16
      w2: [16*C1, C2]  rows = (kh*4+kw)*C1 + ic, bf16
      w3: [(H/4)*(W/4), C2]  rows = out_row*(W/4) + out_col, f32
    # TODO(synk): channel widths / 0.05*normal init are placeholders; the torch
    # CovDiscriminator body is not given in the reference source.
    """

    def __init__(self, in_ch, img_size, key, c1=64, c2=128, slope=0.2):
        assert img_size % 4 == 0
        k1, k2, k3, k4, k5, k6 = jax.random.split(key, 6)
        self.in_ch, self.c1, self.c2, self.slope = in_ch, c1, c2, slope
        self.A = img_size // 4
        self.w1 = (0.05 * jax.random.normal(k1, (16 * in_ch, c1), jnp.float32)
                   ).astype(jnp.bfloat16)
        self.b1 = 0.05 * jax.random.normal(k2, (1, c1), jnp.float32)
        self.w2 = (0.05 * jax.random.normal(k3, (16 * c1, c2), jnp.float32)
                   ).astype(jnp.bfloat16)
        self.b2 = 0.05 * jax.random.normal(k4, (1, c2), jnp.float32)
        self.w3 = 0.05 * jax.random.normal(k5, (self.A * self.A, c2), jnp.float32)
        self.b3 = 0.05 * jax.random.normal(k6, (1, 1), jnp.float32)

    def __call__(self, img):
        return _critic_forward(img, self.w1, self.b1, self.w2, self.b2,
                               self.w3, self.b3, slope=self.slope)


class Discriminator:
    def __init__(self, model_name, in_ch=4, img_size=16, key=jax.random.PRNGKey(0)):
        self.module = ""
        if model_name == "cov":
            self.module = CovDiscriminator(in_ch, img_size, key)
        elif model_name == "vit":
            # TODO(synk): VITDiscriminator body not provided in the reference source.
            raise NotImplementedError("vit branch not defined in reference code")

    def __call__(self, img):
        return self.module(img)


# ---------------------------------------------------------------------------
# Pure-JAX reference (f32 lax.conv, same bf16 rounding points as the kernel)
# for a tight tolerance check of the parity-split indexing.
# ---------------------------------------------------------------------------
def _reference_forward(img, disc):
    hp = jax.lax.Precision.HIGHEST
    x = img.astype(jnp.bfloat16).astype(jnp.float32)
    w1 = disc.w1.astype(jnp.float32).reshape(4, 4, disc.in_ch, disc.c1
                                             ).transpose(3, 2, 0, 1)
    w2 = disc.w2.astype(jnp.float32).reshape(4, 4, disc.c1, disc.c2
                                             ).transpose(3, 2, 0, 1)

    def conv(x, w, b):
        y = jax.lax.conv_general_dilated(
            x, w, window_strides=(2, 2), padding=((1, 1), (1, 1)),
            dimension_numbers=("NCHW", "OIHW", "NCHW"), precision=hp)
        y = y + b.reshape(1, -1, 1, 1)
        return jnp.where(y > 0, y, disc.slope * y)

    h1 = conv(x, w1, disc.b1).astype(jnp.bfloat16).astype(jnp.float32)
    h2 = conv(h1, w2, disc.b2)
    A = h2.shape[-1]
    w3 = disc.w3.reshape(A, A, disc.c2)
    score = jnp.einsum("bcij,ijc->b", h2, w3, precision=hp) + disc.b3[0, 0]
    return score[:, None]


# ---------------------------------------------------------------------------
if __name__ == "__main__":
    key = jax.random.PRNGKey(0)
    k_img, k_params = jax.random.split(key)

    B, C, H, W = 2, 4, 16, 16                 # small NCHW input
    img = jax.random.normal(k_img, (B, C, H, W), jnp.float32)

    disc = Discriminator("cov", in_ch=C, img_size=H, key=k_params)
    score = jax.block_until_ready(disc(img))

    assert score.shape == (B, 1), score.shape
    assert bool(jnp.all(jnp.isfinite(score)))

    ref = jax.block_until_ready(_reference_forward(img, disc.module))
    err = float(jnp.max(jnp.abs(score - ref)))
    assert err < 1e-3, f"kernel vs reference mismatch: {err}"

    print("KERNEL_OK")
</pallas_src>

<mosaic_0001>
module attributes {stable_mosaic.version = 11 : i64} {
  func.func @_critic_kernel(%arg0: i32, %arg1: memref<4x32x64xbf16, #tpu.memory_space<vmem>>, %arg2: memref<64x64xbf16, #tpu.memory_space<vmem>>, %arg3: memref<1x64xf32, #tpu.memory_space<vmem>>, %arg4: memref<1024x128xbf16, #tpu.memory_space<vmem>>, %arg5: memref<1x128xf32, #tpu.memory_space<vmem>>, %arg6: memref<16x128xf32, #tpu.memory_space<vmem>>, %arg7: memref<1x1xf32, #tpu.memory_space<vmem>>, %arg8: memref<2x1xf32, #tpu.memory_space<vmem>>, %arg9: memref<2x2x2x6x6x64xbf16, #tpu.memory_space<vmem>>, %arg10: memref<32x1024xbf16, #tpu.memory_space<vmem>>) attributes {dimension_semantics = [#tpu.dimension_semantics<parallel>], iteration_bounds = array<i64: 1>, scalar_prefetch = 0 : i64, scratch_operands = 2 : i64, tpu.core_type = #tpu.core_type<tc>, window_params = [{transform_indices = @transform_0, window_bounds = array<i64: 4, 32, 64>}, {pipeline_mode = #tpu.pipeline_mode<synchronous>, transform_indices = @transform_1, window_bounds = array<i64: 64, 64>}, {pipeline_mode = #tpu.pipeline_mode<synchronous>, transform_indices = @transform_2, window_bounds = array<i64: 1, 64>}, {pipeline_mode = #tpu.pipeline_mode<synchronous>, transform_indices = @transform_3, window_bounds = array<i64: 1024, 128>}, {pipeline_mode = #tpu.pipeline_mode<synchronous>, transform_indices = @transform_4, window_bounds = array<i64: 1, 128>}, {pipeline_mode = #tpu.pipeline_mode<synchronous>, transform_indices = @transform_5, window_bounds = array<i64: 16, 128>}, {pipeline_mode = #tpu.pipeline_mode<synchronous>, transform_indices = @transform_6, window_bounds = array<i64: 1, 1>}, {transform_indices = @transform_7, window_bounds = array<i64: 2, 1>}]} {
    %c0 = arith.constant 0 : index
    %c0_0 = arith.constant 0 : index
    %c0_1 = arith.constant 0 : index
    %0 = vector.load %arg1[%c0, %c0_0, %c0_1] : memref<4x32x64xbf16, #tpu.memory_space<vmem>>, vector<4x32x64xbf16>
    %1 = vector.shape_cast %0 : vector<4x32x64xbf16> to vector<128x64xbf16>
    %c0_2 = arith.constant 0 : index
    %c0_3 = arith.constant 0 : index
    %2 = vector.load %arg2[%c0_2, %c0_3] : memref<64x64xbf16, #tpu.memory_space<vmem>>, vector<64x64xbf16>
    %cst = arith.constant dense<0.000000e+00> : vector<128x64xf32>
    %3 = tpu.matmul %1, %2, %cst {dimension_numbers = #tpu.dot_dimension_numbers<[1], [0], [0], [1], [0, 0, 1, 1], [], []>} : vector<128x64xbf16>, vector<64x64xbf16>, vector<128x64xf32> -> vector<128x64xf32>
    %c0_4 = arith.constant 0 : index
    %c0_5 = arith.constant 0 : index
    %4 = vector.load %arg3[%c0_4, %c0_5] : memref<1x64xf32, #tpu.memory_space<vmem>>, vector<1x64xf32>
    %5 = vector.broadcast %4 : vector<1x64xf32> to vector<128x64xf32>
    %6 = arith.addf %3, %5 : vector<128x64xf32>
    %cst_6 = arith.constant 0.000000e+00 : f32
    %7 = vector.broadcast %cst_6 : f32 to vector<128x64xf32>
    %8 = arith.cmpf ogt, %6, %7 : vector<128x64xf32>
    %cst_7 = arith.constant 2.000000e-01 : f32
    %9 = vector.broadcast %cst_7 : f32 to vector<128x64xf32>
    %10 = arith.mulf %9, %6 : vector<128x64xf32>
    %11 = arith.select %8, %6, %10 : vector<128x64xi1>, vector<128x64xf32>
    %12 = arith.truncf %11 : vector<128x64xf32> to vector<128x64xbf16>
    %cst_8 = arith.constant 0.000000e+00 : bf16
    %13 = vector.broadcast %cst_8 : bf16 to vector<2x2x2x6x6x64xbf16>
    %c0_9 = arith.constant 0 : index
    %c0_10 = arith.constant 0 : index
    %c0_11 = arith.constant 0 : index
    %c0_12 = arith.constant 0 : index
    %c0_13 = arith.constant 0 : index
    %c0_14 = arith.constant 0 : index
    %14 = vector.load %arg9[%c0_9, %c0_10, %c0_11, %c0_12, %c0_13, %c0_14] : memref<2x2x2x6x6x64xbf16, #tpu.memory_space<vmem>>, vector<2x2x2x6x6x64xbf16>
    tpu.vector_store %arg9[%c0_9, %c0_10, %c0_11, %c0_12, %c0_13, %c0_14], %13 {strides = array<i32>} : memref<2x2x2x6x6x64xbf16, #tpu.memory_space<vmem>>, vector<2x2x2x6x6x64xbf16>,
    %15 = vector.extract_strided_slice %12 {offsets = [0, 0], sizes = [32, 64], strides = [1, 1]} : vector<128x64xbf16> to vector<32x64xbf16>
    %16 = vector.shape_cast %15 : vector<32x64xbf16> to vector<2x4x4x64xbf16>
    %c0_15 = arith.constant 0 : index
    %c0_16 = arith.constant 0 : index
    %c0_17 = arith.constant 0 : index
    %c1 = arith.constant 1 : index
    %c1_18 = arith.constant 1 : index
    %c0_19 = arith.constant 0 : index
    %17 = vector.load %arg9[%c0_15, %c0_16, %c0_17, %c1, %c1_18, %c0_19] : memref<2x2x2x6x6x64xbf16, #tpu.memory_space<vmem>>, vector<1x1x2x4x4x64xbf16>
    %18 = vector.shape_cast %17 : vector<1x1x2x4x4x64xbf16> to vector<2x4x4x64xbf16>
    %19 = vector.shape_cast %16 : vector<2x4x4x64xbf16> to vector<1x1x2x4x4x64xbf16>
    tpu.vector_store %arg9[%c0_15, %c0_16, %c0_17, %c1, %c1_18, %c0_19], %19 {strides = array<i32>} : memref<2x2x2x6x6x64xbf16, #tpu.memory_space<vmem>>, vector<1x1x2x4x4x64xbf16>,
    %20 = vector.extract_strided_slice %12 {offsets = [32, 0], sizes = [32, 64], strides = [1, 1]} : vector<128x64xbf16> to vector<32x64xbf16>
    %21 = vector.shape_cast %20 : vector<32x64xbf16> to vector<2x4x4x64xbf16>
    %c0_20 = arith.constant 0 : index
    %c1_21 = arith.constant 1 : index
    %c0_22 = arith.constant 0 : index
    %c1_23 = arith.constant 1 : index
    %c1_24 = arith.constant 1 : index
    %c0_25 = arith.constant 0 : index
    %22 = vector.load %arg9[%c0_20, %c1_21, %c0_22, %c1_23, %c1_24, %c0_25] : memref<2x2x2x6x6x64xbf16, #tpu.memory_space<vmem>>, vector<1x1x2x4x4x64xbf16>
    %23 = vector.shape_cast %22 : vector<1x1x2x4x4x64xbf16> to vector<2x4x4x64xbf16>
    %24 = vector.shape_cast %21 : vector<2x4x4x64xbf16> to vector<1x1x2x4x4x64xbf16>
    tpu.vector_store %arg9[%c0_20, %c1_21, %c0_22, %c1_23, %c1_24, %c0_25], %24 {strides = array<i32>} : memref<2x2x2x6x6x64xbf16, #tpu.memory_space<vmem>>, vector<1x1x2x4x4x64xbf16>,
    %25 = vector.extract_strided_slice %12 {offsets = [64, 0], sizes = [32, 64], strides = [1, 1]} : vector<128x64xbf16> to vector<32x64xbf16>
    %26 = vector.shape_cast %25 : vector<32x64xbf16> to vector<2x4x4x64xbf16>
    %c1_26 = arith.constant 1 : index
    %c0_27 = arith.constant 0 : index
    %c0_28 = arith.constant 0 : index
    %c1_29 = arith.constant 1 : index
    %c1_30 = arith.constant 1 : index
    %c0_31 = arith.constant 0 : index
    %27 = vector.load %arg9[%c1_26, %c0_27, %c0_28, %c1_29, %c1_30, %c0_31] : memref<2x2x2x6x6x64xbf16, #tpu.memory_space<vmem>>, vector<1x1x2x4x4x64xbf16>
    %28 = vector.shape_cast %27 : vector<1x1x2x4x4x64xbf16> to vector<2x4x4x64xbf16>
    %29 = vector.shape_cast %26 : vector<2x4x4x64xbf16> to vector<1x1x2x4x4x64xbf16>
    tpu.vector_store %arg9[%c1_26, %c0_27, %c0_28, %c1_29, %c1_30, %c0_31], %29 {strides = array<i32>} : memref<2x2x2x6x6x64xbf16, #tpu.memory_space<vmem>>, vector<1x1x2x4x4x64xbf16>,
    %30 = vector.extract_strided_slice %12 {offsets = [96, 0], sizes = [32, 64], strides = [1, 1]} : vector<128x64xbf16> to vector<32x64xbf16>
    %31 = vector.shape_cast %30 : vector<32x64xbf16> to vector<2x4x4x64xbf16>
    %c1_32 = arith.constant 1 : index
    %c1_33 = arith.constant 1 : index
    %c0_34 = arith.constant 0 : index
    %c1_35 = arith.constant 1 : index
    %c1_36 = arith.constant 1 : index
    %c0_37 = arith.constant 0 : index
    %32 = vector.load %arg9[%c1_32, %c1_33, %c0_34, %c1_35, %c1_36, %c0_37] : memref<2x2x2x6x6x64xbf16, #tpu.memory_space<vmem>>, vector<1x1x2x4x4x64xbf16>
    %33 = vector.shape_cast %32 : vector<1x1x2x4x4x64xbf16> to vector<2x4x4x64xbf16>
    %34 = vector.shape_cast %31 : vector<2x4x4x64xbf16> to vector<1x1x2x4x4x64xbf16>
    tpu.vector_store %arg9[%c1_32, %c1_33, %c0_34, %c1_35, %c1_36, %c0_37], %34 {strides = array<i32>} : memref<2x2x2x6x6x64xbf16, #tpu.memory_space<vmem>>, vector<1x1x2x4x4x64xbf16>,
    %c1_38 = arith.constant 1 : index
    %c1_39 = arith.constant 1 : index
    %c0_40 = arith.constant 0 : index
    %c0_41 = arith.constant 0 : index
    %c0_42 = arith.constant 0 : index
    %c0_43 = arith.constant 0 : index
    %35 = vector.load %arg9[%c1_38, %c1_39, %c0_40, %c0_41, %c0_42, %c0_43] : memref<2x2x2x6x6x64xbf16, #tpu.memory_space<vmem>>, vector<1x1x2x4x4x64xbf16>
    %36 = vector.shape_cast %35 : vector<1x1x2x4x4x64xbf16> to vector<2x4x4x64xbf16>
    %37 = vector.shape_cast %36 : vector<2x4x4x64xbf16> to vector<32x64xbf16>
    %c0_44 = arith.constant 0 : index
    %c0_45 = arith.constant 0 : index
    %38 = vector.load %arg10[%c0_44, %c0_45] : memref<32x1024xbf16, #tpu.memory_space<vmem>>, vector<32x64xbf16>
    tpu.vector_store %arg10[%c0_44, %c0_45], %37 {strides = array<i32>} : memref<32x1024xbf16, #tpu.memory_space<vmem>>, vector<32x64xbf16>,
    %c1_46 = arith.constant 1 : index
    %c0_47 = arith.constant 0 : index
    %c0_48 = arith.constant 0 : index
    %c0_49 = arith.constant 0 : index
    %c1_50 = arith.constant 1 : index
    %c0_51 = arith.constant 0 : index
    %39 = vector.load %arg9[%c1_46, %c0_47, %c0_48, %c0_49, %c1_50, %c0_51] : memref<2x2x2x6x6x64xbf16, #tpu.memory_space<vmem>>, vector<1x1x2x4x4x64xbf16>
    %40 = vector.shape_cast %39 : vector<1x1x2x4x4x64xbf16> to vector<2x4x4x64xbf16>
    %41 = vector.shape_cast %40 : vector<2x4x4x64xbf16> to vector<32x64xbf16>
    %c0_52 = arith.constant 0 : index
    %c64 = arith.constant 64 : index
    %42 = vector.load %arg10[%c0_52, %c64] : memref<32x1024xbf16, #tpu.memory_space<vmem>>, vector<32x64xbf16>
    tpu.vector_store %arg10[%c0_52, %c64], %41 {strides = array<i32>} : memref<32x1024xbf16, #tpu.memory_space<vmem>>, vector<32x64xbf16>,
    %c1_53 = arith.constant 1 : index
    %c1_54 = arith.constant 1 : index
    %c0_55 = arith.constant 0 : index
    %c0_56 = arith.constant 0 : index
    %c1_57 = arith.constant 1 : index
    %c0_58 = arith.constant 0 : index
    %43 = vector.load %arg9[%c1_53, %c1_54, %c0_55, %c0_56, %c1_57, %c0_58] : memref<2x2x2x6x6x64xbf16, #tpu.memory_space<vmem>>, vector<1x1x2x4x4x64xbf16>
    %44 = vector.shape_cast %43 : vector<1x1x2x4x4x64xbf16> to vector<2x4x4x64xbf16>
    %45 = vector.shape_cast %44 : vector<2x4x4x64xbf16> to vector<32x64xbf16>
    %c0_59 = arith.constant 0 : index
    %c128 = arith.constant 128 : index
    %46 = vector.load %arg10[%c0_59, %c128] : memref<32x1024xbf16, #tpu.memory_space<vmem>>, vector<32x64xbf16>
    tpu.vector_store %arg10[%c0_59, %c128], %45 {strides = array<i32>} : memref<32x1024xbf16, #tpu.memory_space<vmem>>, vector<32x64xbf16>,
    %c1_60 = arith.constant 1 : index
    %c0_61 = arith.constant 0 : index
    %c0_62 = arith.constant 0 : index
    %c0_63 = arith.constant 0 : index
    %c2 = arith.constant 2 : index
    %c0_64 = arith.constant 0 : index
    %47 = vector.load %arg9[%c1_60, %c0_61, %c0_62, %c0_63, %c2, %c0_64] : memref<2x2x2x6x6x64xbf16, #tpu.memory_space<vmem>>, vector<1x1x2x4x4x64xbf16>
    %48 = vector.shape_cast %47 : vector<1x1x2x4x4x64xbf16> to vector<2x4x4x64xbf16>
    %49 = vector.shape_cast %48 : vector<2x4x4x64xbf16> to vector<32x64xbf16>
    %c0_65 = arith.constant 0 : index
    %c192 = arith.constant 192 : index
    %50 = vector.load %arg10[%c0_65, %c192] : memref<32x1024xbf16, #tpu.memory_space<vmem>>, vector<32x64xbf16>
    tpu.vector_store %arg10[%c0_65, %c192], %49 {strides = array<i32>} : memref<32x1024xbf16, #tpu.memory_space<vmem>>, vector<32x64xbf16>,
    %c0_66 = arith.constant 0 : index
    %c1_67 = arith.constant 1 : index
    %c0_68 = arith.constant 0 : index
    %c1_69 = arith.constant 1 : index
    %c0_70 = arith.constant 0 : index
    %c0_71 = arith.constant 0 : index
    %51 = vector.load %arg9[%c0_66, %c1_67, %c0_68, %c1_69, %c0_70, %c0_71] : memref<2x2x2x6x6x64xbf16, #tpu.memory_space<vmem>>, vector<1x1x2x4x4x64xbf16>
    %52 = vector.shape_cast %51 : vector<1x1x2x4x4x64xbf16> to vector<2x4x4x64xbf16>
    %53 = vector.shape_cast %52 : vector<2x4x4x64xbf16> to vector<32x64xbf16>
    %c0_72 = arith.constant 0 : index
    %c256 = arith.constant 256 : index
    %54 = vector.load %arg10[%c0_72, %c256] : memref<32x1024xbf16, #tpu.memory_space<vmem>>, vector<32x64xbf16>
    tpu.vector_store %arg10[%c0_72, %c256], %53 {strides = array<i32>} : memref<32x1024xbf16, #tpu.memory_space<vmem>>, vector<32x64xbf16>,
    %c0_73 = arith.constant 0 : index
    %c0_74 = arith.constant 0 : index
    %c0_75 = arith.constant 0 : index
    %c1_76 = arith.constant 1 : index
    %c1_77 = arith.constant 1 : index
    %c0_78 = arith.constant 0 : index
    %55 = vector.load %arg9[%c0_73, %c0_74, %c0_75, %c1_76, %c1_77, %c0_78] : memref<2x2x2x6x6x64xbf16, #tpu.memory_space<vmem>>, vector<1x1x2x4x4x64xbf16>
    %56 = vector.shape_cast %55 : vector<1x1x2x4x4x64xbf16> to vector<2x4x4x64xbf16>
    %57 = vector.shape_cast %56 : vector<2x4x4x64xbf16> to vector<32x64xbf16>
    %c0_79 = arith.constant 0 : index
    %c320 = arith.constant 320 : index
    %58 = vector.load %arg10[%c0_79, %c320] : memref<32x1024xbf16, #tpu.memory_space<vmem>>, vector<32x64xbf16>
    tpu.vector_store %arg10[%c0_79, %c320], %57 {strides = array<i32>} : memref<32x1024xbf16, #tpu.memory_space<vmem>>, vector<32x64xbf16>,
    %c0_80 = arith.constant 0 : index
    %c1_81 = arith.constant 1 : index
    %c0_82 = arith.constant 0 : index
    %c1_83 = arith.constant 1 : index
    %c1_84 = arith.constant 1 : index
    %c0_85 = arith.constant 0 : index
    %59 = vector.load %arg9[%c0_80, %c1_81, %c0_82, %c1_83, %c1_84, %c0_85] : memref<2x2x2x6x6x64xbf16, #tpu.memory_space<vmem>>, vector<1x1x2x4x4x64xbf16>
    %60 = vector.shape_cast %59 : vector<1x1x2x4x4x64xbf16> to vector<2x4x4x64xbf16>
    %61 = vector.shape_cast %60 : vector<2x4x4x64xbf16> to vector<32x64xbf16>
    %c0_86 = arith.constant 0 : index
    %c384 = arith.constant 384 : index
    %62 = vector.load %arg10[%c0_86, %c384] : memref<32x1024xbf16, #tpu.memory_space<vmem>>, vector<32x64xbf16>
    tpu.vector_store %arg10[%c0_86, %c384], %61 {strides = array<i32>} : memref<32x1024xbf16, #tpu.memory_space<vmem>>, vector<32x64xbf16>,
    %c0_87 = arith.constant 0 : index
    %c0_88 = arith.constant 0 : index
    %c0_89 = arith.constant 0 : index
    %c1_90 = arith.constant 1 : index
    %c2_91 = arith.constant 2 : index
    %c0_92 = arith.constant 0 : index
    %63 = vector.load %arg9[%c0_87, %c0_88, %c0_89, %c1_90, %c2_91, %c0_92] : memref<2x2x2x6x6x64xbf16, #tpu.memory_space<vmem>>, vector<1x1x2x4x4x64xbf16>
    %64 = vector.shape_cast %63 : vector<1x1x2x4x4x64xbf16> to vector<2x4x4x64xbf16>
    %65 = vector.shape_cast %64 : vector<2x4x4x64xbf16> to vector<32x64xbf16>
    %c0_93 = arith.constant 0 : index
    %c448 = arith.constant 448 : index
    %66 = vector.load %arg10[%c0_93, %c448] : memref<32x1024xbf16, #tpu.memory_space<vmem>>, vector<32x64xbf16>
    tpu.vector_store %arg10[%c0_93, %c448], %65 {strides = array<i32>} : memref<32x1024xbf16, #tpu.memory_space<vmem>>, vector<32x64xbf16>,
    %c1_94 = arith.constant 1 : index
    %c1_95 = arith.constant 1 : index
    %c0_96 = arith.constant 0 : index
    %c1_97 = arith.constant 1 : index
    %c0_98 = arith.constant 0 : index
    %c0_99 = arith.constant 0 : index
    %67 = vector.load %arg9[%c1_94, %c1_95, %c0_96, %c1_97, %c0_98, %c0_99] : memref<2x2x2x6x6x64xbf16, #tpu.memory_space<vmem>>, vector<1x1x2x4x4x64xbf16>
    %68 = vector.shape_cast %67 : vector<1x1x2x4x4x64xbf16> to vector<2x4x4x64xbf16>
    %69 = vector.shape_cast %68 : vector<2x4x4x64xbf16> to vector<32x64xbf16>
    %c0_100 = arith.constant 0 : index
    %c512 = arith.constant 512 : index
    %70 = vector.load %arg10[%c0_100, %c512] : memref<32x1024xbf16, #tpu.memory_space<vmem>>, vector<32x64xbf16>
    tpu.vector_store %arg10[%c0_100, %c512], %69 {strides = array<i32>} : memref<32x1024xbf16, #tpu.memory_space<vmem>>, vector<32x64xbf16>,
    %c1_101 = arith.constant 1 : index
    %c0_102 = arith.constant 0 : index
    %c0_103 = arith.constant 0 : index
    %c1_104 = arith.constant 1 : index
    %c1_105 = arith.constant 1 : index
    %c0_106 = arith.constant 0 : index
    %71 = vector.load %arg9[%c1_101, %c0_102, %c0_103, %c1_104, %c1_105, %c0_106] : memref<2x2x2x6x6x64xbf16, #tpu.memory_space<vmem>>, vector<1x1x2x4x4x64xbf16>
    %72 = vector.shape_cast %71 : vector<1x1x2x4x4x64xbf16> to vector<2x4x4x64xbf16>
    %73 = vector.shape_cast %72 : vector<2x4x4x64xbf16> to vector<32x64xbf16>
    %c0_107 = arith.constant 0 : index
    %c576 = arith.constant 576 : index
    %74 = vector.load %arg10[%c0_107, %c576] : memref<32x1024xbf16, #tpu.memory_space<vmem>>, vector<32x64xbf16>
    tpu.vector_store %arg10[%c0_107, %c576], %73 {strides = array<i32>} : memref<32x1024xbf16, #tpu.memory_space<vmem>>, vector<32x64xbf16>,
    %c1_108 = arith.constant 1 : index
    %c1_109 = arith.constant 1 : index
    %c0_110 = arith.constant 0 : index
    %c1_111 = arith.constant 1 : index
    %c1_112 = arith.constant 1 : index
    %c0_113 = arith.constant 0 : index
    %75 = vector.load %arg9[%c1_108, %c1_109, %c0_110, %c1_111, %c1_112, %c0_113] : memref<2x2x2x6x6x64xbf16, #tpu.memory_space<vmem>>, vector<1x1x2x4x4x64xbf16>
    %76 = vector.shape_cast %75 : vector<1x1x2x4x4x64xbf16> to vector<2x4x4x64xbf16>
    %77 = vector.shape_cast %76 : vector<2x4x4x64xbf16> to vector<32x64xbf16>
    %c0_114 = arith.constant 0 : index
    %c640 = arith.constant 640 : index
    %78 = vector.load %arg10[%c0_114, %c640] : memref<32x1024xbf16, #tpu.memory_space<vmem>>, vector<32x64xbf16>
    tpu.vector_store %arg10[%c0_114, %c640], %77 {strides = array<i32>} : memref<32x1024xbf16, #tpu.memory_space<vmem>>, vector<32x64xbf16>,
    %c1_115 = arith.constant 1 : index
    %c0_116 = arith.constant 0 : index
    %c0_117 = arith.constant 0 : index
    %c1_118 = arith.constant 1 : index
    %c2_119 = arith.constant 2 : index
    %c0_120 = arith.constant 0 : index
    %79 = vector.load %arg9[%c1_115, %c0_116, %c0_117, %c1_118, %c2_119, %c0_120] : memref<2x2x2x6x6x64xbf16, #tpu.memory_space<vmem>>, vector<1x1x2x4x4x64xbf16>
    %80 = vector.shape_cast %79 : vector<1x1x2x4x4x64xbf16> to vector<2x4x4x64xbf16>
    %81 = vector.shape_cast %80 : vector<2x4x4x64xbf16> to vector<32x64xbf16>
    %c0_121 = arith.constant 0 : index
    %c704 = arith.constant 704 : index
    %82 = vector.load %arg10[%c0_121, %c704] : memref<32x1024xbf16, #tpu.memory_space<vmem>>, vector<32x64xbf16>
    tpu.vector_store %arg10[%c0_121, %c704], %81 {strides = array<i32>} : memref<32x1024xbf16, #tpu.memory_space<vmem>>, vector<32x64xbf16>,
    %c0_122 = arith.constant 0 : index
    %c1_123 = arith.constant 1 : index
    %c0_124 = arith.constant 0 : index
    %c2_125 = arith.constant 2 : index
    %c0_126 = arith.constant 0 : index
    %c0_127 = arith.constant 0 : index
    %83 = vector.load %arg9[%c0_122, %c1_123, %c0_124, %c2_125, %c0_126, %c0_127] : memref<2x2x2x6x6x64xbf16, #tpu.memory_space<vmem>>, vector<1x1x2x4x4x64xbf16>
    %84 = vector.shape_cast %83 : vector<1x1x2x4x4x64xbf16> to vector<2x4x4x64xbf16>
    %85 = vector.shape_cast %84 : vector<2x4x4x64xbf16> to vector<32x64xbf16>
    %c0_128 = arith.constant 0 : index
    %c768 = arith.constant 768 : index
    %86 = vector.load %arg10[%c0_128, %c768] : memref<32x1024xbf16, #tpu.memory_space<vmem>>, vector<32x64xbf16>
    tpu.vector_store %arg10[%c0_128, %c768], %85 {strides = array<i32>} : memref<32x1024xbf16, #tpu.memory_space<vmem>>, vector<32x64xbf16>,
    %c0_129 = arith.constant 0 : index
    %c0_130 = arith.constant 0 : index
    %c0_131 = arith.constant 0 : index
    %c2_132 = arith.constant 2 : index
    %c1_133 = arith.constant 1 : index
    %c0_134 = arith.constant 0 : index
    %87 = vector.load %arg9[%c0_129, %c0_130, %c0_131, %c2_132, %c1_133, %c0_134] : memref<2x2x2x6x6x64xbf16, #tpu.memory_space<vmem>>, vector<1x1x2x4x4x64xbf16>
    %88 = vector.shape_cast %87 : vector<1x1x2x4x4x64xbf16> to vector<2x4x4x64xbf16>
    %89 = vector.shape_cast %88 : vector<2x4x4x64xbf16> to vector<32x64xbf16>
    %c0_135 = arith.constant 0 : index
    %c832 = arith.constant 832 : index
    %90 = vector.load %arg10[%c0_135, %c832] : memref<32x1024xbf16, #tpu.memory_space<vmem>>, vector<32x64xbf16>
    tpu.vector_store %arg10[%c0_135, %c832], %89 {strides = array<i32>} : memref<32x1024xbf16, #tpu.memory_space<vmem>>, vector<32x64xbf16>,
    %c0_136 = arith.constant 0 : index
    %c1_137 = arith.constant 1 : index
    %c0_138 = arith.constant 0 : index
    %c2_139 = arith.constant 2 : index
    %c1_140 = arith.constant 1 : index
    %c0_141 = arith.constant 0 : index
    %91 = vector.load %arg9[%c0_136, %c1_137, %c0_138, %c2_139, %c1_140, %c0_141] : memref<2x2x2x6x6x64xbf16, #tpu.memory_space<vmem>>, vector<1x1x2x4x4x64xbf16>
    %92 = vector.shape_cast %91 : vector<1x1x2x4x4x64xbf16> to vector<2x4x4x64xbf16>
    %93 = vector.shape_cast %92 : vector<2x4x4x64xbf16> to vector<32x64xbf16>
    %c0_142 = arith.constant 0 : index
    %c896 = arith.constant 896 : index
    %94 = vector.load %arg10[%c0_142, %c896] : memref<32x1024xbf16, #tpu.memory_space<vmem>>, vector<32x64xbf16>
    tpu.vector_store %arg10[%c0_142, %c896], %93 {strides = array<i32>} : memref<32x1024xbf16, #tpu.memory_space<vmem>>, vector<32x64xbf16>,
    %c0_143 = arith.constant 0 : index
    %c0_144 = arith.constant 0 : index
    %c0_145 = arith.constant 0 : index
    %c2_146 = arith.constant 2 : index
    %c2_147 = arith.constant 2 : index
    %c0_148 = arith.constant 0 : index
    %95 = vector.load %arg9[%c0_143, %c0_144, %c0_145, %c2_146, %c2_147, %c0_148] : memref<2x2x2x6x6x64xbf16, #tpu.memory_space<vmem>>, vector<1x1x2x4x4x64xbf16>
    %96 = vector.shape_cast %95 : vector<1x1x2x4x4x64xbf16> to vector<2x4x4x64xbf16>
    %97 = vector.shape_cast %96 : vector<2x4x4x64xbf16> to vector<32x64xbf16>
    %c0_149 = arith.constant 0 : index
    %c960 = arith.constant 960 : index
    %98 = vector.load %arg10[%c0_149, %c960] : memref<32x1024xbf16, #tpu.memory_space<vmem>>, vector<32x64xbf16>
    tpu.vector_store %arg10[%c0_149, %c960], %97 {strides = array<i32>} : memref<32x1024xbf16, #tpu.memory_space<vmem>>, vector<32x64xbf16>,
    %c0_150 = arith.constant 0 : index
    %c0_151 = arith.constant 0 : index
    %99 = vector.load %arg10[%c0_150, %c0_151] : memref<32x1024xbf16, #tpu.memory_space<vmem>>, vector<32x1024xbf16>
    %c0_152 = arith.constant 0 : index
    %c0_153 = arith.constant 0 : index
    %100 = vector.load %arg4[%c0_152, %c0_153] : memref<1024x128xbf16, #tpu.memory_space<vmem>>, vector<1024x128xbf16>
    %cst_154 = arith.constant dense<0.000000e+00> : vector<32x128xf32>
    %101 = tpu.matmul %99, %100, %cst_154 {dimension_numbers = #tpu.dot_dimension_numbers<[1], [0], [0], [1], [0, 0, 1, 1], [], []>} : vector<32x1024xbf16>, vector<1024x128xbf16>, vector<32x128xf32> -> vector<32x128xf32>
    %c0_155 = arith.constant 0 : index
    %c0_156 = arith.constant 0 : index
    %102 = vector.load %arg5[%c0_155, %c0_156] : memref<1x128xf32, #tpu.memory_space<vmem>>, vector<1x128xf32>
    %103 = vector.broadcast %102 : vector<1x128xf32> to vector<32x128xf32>
    %104 = arith.addf %101, %103 : vector<32x128xf32>
    %cst_157 = arith.constant 0.000000e+00 : f32
    %105 = vector.broadcast %cst_157 : f32 to vector<32x128xf32>
    %106 = arith.cmpf ogt, %104, %105 : vector<32x128xf32>
    %cst_158 = arith.constant 2.000000e-01 : f32
    %107 = vector.broadcast %cst_158 : f32 to vector<32x128xf32>
    %108 = arith.mulf %107, %104 : vector<32x128xf32>
    %109 = arith.select %106, %104, %108 : vector<32x128xi1>, vector<32x128xf32>
    %110 = vector.shape_cast %109 : vector<32x128xf32> to vector<2x16x128xf32>
    %c0_159 = arith.constant 0 : index
    %c0_160 = arith.constant 0 : index
    %111 = vector.load %arg6[%c0_159, %c0_160] : memref<16x128xf32, #tpu.memory_space<vmem>>, vector<16x128xf32>
    %112 = vector.shape_cast %111 : vector<16x128xf32> to vector<1x16x128xf32>
    %113 = vector.broadcast %112 : vector<1x16x128xf32> to vector<2x16x128xf32>
    %114 = arith.mulf %110, %113 : vector<2x16x128xf32>
    %cst_161 = arith.constant dense<0.000000e+00> : vector<2x16xf32>
    %115 = vector.multi_reduction <add>, %114, %cst_161 [2] : vector<2x16x128xf32> to vector<2x16xf32>
    %cst_162 = arith.constant dense<0.000000e+00> : vector<2xf32>
    %116 = vector.multi_reduction <add>, %115, %cst_162 [1] : vector<2x16xf32> to vector<2xf32>
    %117 = vector.shape_cast %116 : vector<2xf32> to vector<2x1xf32>
    %c0_163 = arith.constant 0 : index
    %c0_164 = arith.constant 0 : index
    %118 = vector.load %arg7[%c0_163, %c0_164] : memref<1x1xf32, #tpu.memory_space<vmem>>, vector<1x1xf32>
    %119 = vector.broadcast %118 : vector<1x1xf32> to vector<2x1xf32>
    %120 = arith.addf %117, %119 : vector<2x1xf32>
    %c0_165 = arith.constant 0 : index
    %c0_166 = arith.constant 0 : index
    %121 = vector.load %arg8[%c0_165, %c0_166] : memref<2x1xf32, #tpu.memory_space<vmem>>, vector<2x1xf32>
    tpu.vector_store %arg8[%c0_165, %c0_166], %120 {strides = array<i32>} : memref<2x1xf32, #tpu.memory_space<vmem>>, vector<2x1xf32>,
    return
  }
  func.func @transform_0(%arg0: i32) -> (i32, i32, i32) {
    %c0_i32 = arith.constant 0 : i32
    %c0_i32_0 = arith.constant 0 : i32
    %c0_i32_1 = arith.constant 0 : i32
    return %c0_i32, %arg0, %c0_i32_0 : i32, i32, i32
  }
  func.func @transform_1(%arg0: i32) -> (i32, i32) {
    %c0_i32 = arith.constant 0 : i32
    %c0_i32_0 = arith.constant 0 : i32
    %c0_i32_1 = arith.constant 0 : i32
    return %c0_i32, %c0_i32_0 : i32, i32
  }
  func.func @transform_2(%arg0: i32) -> (i32, i32) {
    %c0_i32 = arith.constant 0 : i32
    %c0_i32_0 = arith.constant 0 : i32
    %c0_i32_1 = arith.constant 0 : i32
    return %c0_i32, %c0_i32_0 : i32, i32
  }
  func.func @transform_3(%arg0: i32) -> (i32, i32) {
    %c0_i32 = arith.constant 0 : i32
    %c0_i32_0 = arith.constant 0 : i32
    %c0_i32_1 = arith.constant 0 : i32
    return %c0_i32, %c0_i32_0 : i32, i32
  }
  func.func @transform_4(%arg0: i32) -> (i32, i32) {
    %c0_i32 = arith.constant 0 : i32
    %c0_i32_0 = arith.constant 0 : i32
    %c0_i32_1 = arith.constant 0 : i32
    return %c0_i32, %c0_i32_0 : i32, i32
  }
  func.func @transform_5(%arg0: i32) -> (i32, i32) {
    %c0_i32 = arith.constant 0 : i32
    %c0_i32_0 = arith.constant 0 : i32
    %c0_i32_1 = arith.constant 0 : i32
    return %c0_i32, %c0_i32_0 : i32, i32
  }
  func.func @transform_6(%arg0: i32) -> (i32, i32) {
    %c0_i32 = arith.constant 0 : i32
    %c0_i32_0 = arith.constant 0 : i32
    %c0_i32_1 = arith.constant 0 : i32
    return %c0_i32, %c0_i32_0 : i32, i32
  }
  func.func @transform_7(%arg0: i32) -> (i32, i32) {
    %c0_i32 = arith.constant 0 : i32
    %c0_i32_0 = arith.constant 0 : i32
    return %arg0, %c0_i32 : i32, i32
  }
}

</mosaic_0001>

<bundles_post_ra>
// kernel: _critic_forward.1
= control target key start
LH: loop header
LB: loop body
LE: loop exit
PB: predicated region body
PF: predicated region fallthrough
CT: control target
= control target key end

     0   :  { %vm124_vm0 = vcmask 523264   ;;  %vm302_vm1 = vcmask 518144   ;;  %v5072_v12 = vmov 0   ;;  %v6175_v17 = vlaneseq  ;;  %s5074_s11 = smov 64   ;;  %s6167_s1 = inlined_call_operand.vmem [shape: bf16[64,64], index: 1, kind: input, shape index: {}]   ;;  %s6168_s0 = inlined_call_operand.vmem [shape: bf16[4,32,64], index: 0, kind: input, shape index: {}]   ;;  %s6169_s2 = inlined_call_operand.vmem [shape: f32[1,64], index: 2, kind: input, shape index: {}]   ;;  %s6170_s3 = inlined_call_operand.vmem [shape: bf16[1024,128], index: 3, kind: input, shape index: {}]   ;;  %s6171_s4 = inlined_call_operand.vmem [shape: f32[1,128], index: 4, kind: input, shape index: {}]   ;;  %s6172_s5 = inlined_call_operand.vmem [shape: f32[16,128], index: 5, kind: input, shape index: {}]   ;;  %s6173_s6 = inlined_call_operand.<no memory space> [shape: f32[1,1], index: 6, kind: input, shape index: {}]   ;;  %s6174_s7 = inlined_call_operand.vmem [shape: f32[2,1], index: 7, kind: output, shape index: {}]  }
   0x1   :  { %v4963_v0 = vld [vmem:[%s6167_s1] sm:$0xff]   ;;  %v4964_v1 = vld [vmem:[%s6167_s1 + $0x8] sm:$0xff]   ;;  %v4965_v2 = vld [vmem:[%s6167_s1 + $0x10] sm:$0xff]   ;;  %310 = vst.msk [vmem:[#allocation2 + $0x1c] sm:$0x7] %vm302_vm1, %v5072_v12  ;;  %vm1686_vm2 = vcmask 1040384  }
   0x2   :  { %4936 = vmatprep.subr.bf16.mxu0 %v4963_v0  ;;  %v4967_v3 = vld [vmem:[%s6168_s0] sm:$0xff]   ;;  %v4966_v4 = vld [vmem:[%s6167_s1 + $0x18] sm:$0xff]   ;;  %v4968_v5 = vld [vmem:[%s6168_s0 + $0x8] sm:$0xff]   ;;  %311 = vst.msk [vmem:[#allocation2 + $0x20] sm:$0x7] %vm302_vm1, %v5072_v12  ;;  %v5200_v25 = vshrl.u32 %v6175_v17, 7 }
   0x3   :  { %4937 = vmatpush3.bf16.msra.mxu0 %v4963_v0  ;;  %4944 = vmatprep.mubr.msk.bf16.mxu0 %vm124_vm0, %v4967_v3  ;;  %v4969_v6 = vld [vmem:[%s6168_s0 + $0x10] sm:$0xff]   ;;  %v4970_v7 = vld [vmem:[%s6168_s0 + $0x18] sm:$0xff]   ;;  %v4971_v8 = vld [vmem:[%s6168_s0 + $0x20] sm:$0xff]   ;;  %312 = vst.msk [vmem:[#allocation2 + $0x24] sm:$0x7] %vm302_vm1, %v5072_v12  ;;  %vm1687_vm3 = vcmask 1042434  }
   0x4   :  { %4938 = vmatprep.subr.bf16.mxu0 %v4964_v1  ;;  %v4972_v9 = vld [vmem:[%s6168_s0 + $0x28] sm:$0xff]   ;;  %v4973_v10 = vld [vmem:[%s6168_s0 + $0x30] sm:$0xff]   ;;  %v4974_v11 = vld [vmem:[%s6168_s0 + $0x38] sm:$0xff]   ;;  %313 = vst.msk [vmem:[#allocation2 + $0x28] sm:$0x7] %vm302_vm1, %v5072_v12  ;;  %vm1689_vm6 = vcmask 1044484  }
   0x5   :  { %304 = vst.msk [vmem:[#allocation2 + $0x4] sm:$0x7] %vm302_vm1, %v5072_v12  ;;  %305 = vst.msk [vmem:[#allocation2 + $0x8] sm:$0x7] %vm302_vm1, %v5072_v12  ;;  %vm1214_vm4 = vsmask.f32 1280 }
   0x6   :  { %306 = vst.msk [vmem:[#allocation2 + $0xc] sm:$0x7] %vm302_vm1, %v5072_v12  ;;  %307 = vst.msk [vmem:[#allocation2 + $0x10] sm:$0x7] %vm302_vm1, %v5072_v12  ;;  %v5073_v30 = vmov 1983009808  }
   0x7   :  { %4939 = vmatpush3.bf16.msra.mxu0 %v4964_v1  ;;  %308 = vst.msk [vmem:[#allocation2 + $0x14] sm:$0x7] %vm302_vm1, %v5072_v12  ;;  %314 = vst.msk [vmem:[#allocation2 + $0x2c] sm:$0x7] %vm302_vm1, %v5072_v12  ;;  %v355_v31 = vunpack.c.l.s4 %v5073_v30  ;;  %vm1215_vm5 = vsmask.f32 3336 }
   0x8   :  { %4940 = vmatprep.subr.bf16.mxu0 %v4965_v2  ;;  %316 = vst.msk [vmem:[#allocation2 + $0x34] sm:$0x7] %vm302_vm1, %v5072_v12  ;;  %317 = vst.msk [vmem:[#allocation2 + $0x38] sm:$0x7] %vm302_vm1, %v5072_v12  ;;  %vm1691_vm7 = vcmask 1046534  }
   0x9   :  { %318 = vst.msk [vmem:[#allocation2 + $0x3c] sm:$0x7] %vm302_vm1, %v5072_v12  ;;  %319 = vst.msk [vmem:[#allocation2 + $0x40] sm:$0x7] %vm302_vm1, %v5072_v12  ;;  %vm1217_vm9 = vsmask.f32 5392  ;;  %v356_v46 = vunpack.c.0.s8 %v355_v31 }
   0xa   :  { %320 = vst.msk [vmem:[#allocation2 + $0x44] sm:$0x7] %vm302_vm1, %v5072_v12  ;;  %322 = vst.msk [vmem:[#allocation2 + $0x4c] sm:$0x7] %vm302_vm1, %v5072_v12  ;;  %vm1219_vm10 = vsmask.f32 7448 }
   0xb   :  { %4941 = vmatpush3.bf16.msra.mxu0 %v4965_v2  ;;  %323 = vst.msk [vmem:[#allocation2 + $0x50] sm:$0x7] %vm302_vm1, %v5072_v12  ;;  %324 = vst.msk [vmem:[#allocation2 + $0x54] sm:$0x7] %vm302_vm1, %v5072_v12  ;;  %v5229_v57 = vld [vmem:[%s6169_s2] ss:$0 sm:$0xff]  ;;  %v5239_v3 = vsub.s32 %v356_v46, %v5200_v25 }
   0xc   :  { %4942 = vmatprep.subr.bf16.mxu0 %v4966_v4  ;;  %325 = vst.msk [vmem:[#allocation2 + $0x58] sm:$0x7] %vm302_vm1, %v5072_v12  ;;  %326 = vst.msk [vmem:[#allocation2 + $0x5c] sm:$0x7] %vm302_vm1, %v5072_v12 }
   0xd   :  { %327 = vst.msk [vmem:[#allocation2 + $0x60] sm:$0x7] %vm302_vm1, %v5072_v12  ;;  %328 = vst.msk [vmem:[#allocation2 + $0x64] sm:$0x7] %vm302_vm1, %v5072_v12 }
   0xe   :  { %329 = vst.msk [vmem:[#allocation2 + $0x68] sm:$0x7] %vm302_vm1, %v5072_v12  ;;  %330 = vst.msk [vmem:[#allocation2 + $0x6c] sm:$0x7] %vm302_vm1, %v5072_v12 }
   0xf   :  { %4943 = vmatpush3.bf16.msra.mxu0 %v4966_v4  ;;  %331 = vst.msk [vmem:[#allocation2 + $0x70] sm:$0x7] %vm302_vm1, %v5072_v12  ;;  %333 = vst.msk [vmem:[#allocation2 + $0x78] sm:$0x7] %vm302_vm1, %v5072_v12  ;;  %v5039_v4 = vld [vmem:[%s6170_s3 + $0x1f0] sm:$0xff]  }
  0x10   :  { %334 = vst.msk [vmem:[#allocation2 + $0x7c] sm:$0x7] %vm302_vm1, %v5072_v12  ;;  %335 = vst.msk [vmem:[#allocation2 + $0x80] sm:$0x7] %vm302_vm1, %v5072_v12 }
  0x11   :  { %336 = vst.msk [vmem:[#allocation2 + $0x84] sm:$0x7] %vm302_vm1, %v5072_v12  ;;  %337 = vst.msk [vmem:[#allocation2 + $0x88] sm:$0x7] %vm302_vm1, %v5072_v12 }
  0x12   :  { %4945 = vmatmul.mubr.msk.bf16.vlgmr.msra.gmra.mrb[0].mxu0 %vm124_vm0, %v4968_v5  ;;  %339 = vst.msk [vmem:[#allocation2 + $0x90] sm:$0x7] %vm302_vm1, %v5072_v12  ;;  %340 = vst.msk [vmem:[#allocation2 + $0x94] sm:$0x7] %vm302_vm1, %v5072_v12 }
  0x13   :  { %4948 = vmatprep.mubr.msk.bf16.mxu0 %vm124_vm0, %v4969_v6  ;;  %341 = vst.msk [vmem:[#allocation2 + $0x98] sm:$0x7] %vm302_vm1, %v5072_v12  ;;  %342 = vst.msk [vmem:[#allocation2 + $0x9c] sm:$0x7] %vm302_vm1, %v5072_v12 }
  0x14   :  { %343 = vst.msk [vmem:[#allocation2 + $0xa0] sm:$0x7] %vm302_vm1, %v5072_v12  ;;  %345 = vst.msk [vmem:[#allocation2 + $0xa8] sm:$0x7] %vm302_vm1, %v5072_v12 }
  0x15   :  { %346 = vst.msk [vmem:[#allocation2 + $0xac] sm:$0x7] %vm302_vm1, %v5072_v12  ;;  %347 = vst.msk [vmem:[#allocation2 + $0xb0] sm:$0x7] %vm302_vm1, %v5072_v12 }
  0x16   :  { %348 = vst.msk [vmem:[#allocation2 + $0xb4] sm:$0x7] %vm302_vm1, %v5072_v12  ;;  %349 = vst.msk [vmem:[#allocation2 + $0xb8] sm:$0x7] %vm302_vm1, %v5072_v12 }
  0x17   :  { %v4622_v13 = vld.sshfl [vmem:[#allocation2 + $0x78] sm:$0x13 pattern:$0x76325410]  ;;  %vm5203_vm8 = vmor %vm1686_vm2, %vm1687_vm3 }
  0x18   :  { %v1278_v14 = vshrl.u32 %v4622_v13, 16  ;;  %v1281_v15 = vshll.u32 %v4622_v13, 16  ;;  %v4618_v16 = vld.sshfl [vmem:[#allocation2 + $0x60] sm:$0x13 pattern:$0x76325410]  ;;  %v1189_v23 = vcombine.high %v4622_v13, %v4622_v13  ;;  %vm5208_vm11 = vmor %vm1214_vm4, %vm1215_vm5 }
  0x19   :  { %v1222_v18 = vshrl.u32 %v4618_v16, 16  ;;  %v1225_v19 = vshll.u32 %v4618_v16, 16  ;;  %v4634_v22 = vld.sshfl [vmem:[#allocation2 + $0x60] sm:$0x12 pattern:$0x76325410]  ;;  %v1157_v24 = vcombine.high %v4618_v16, %v4618_v16  ;;  %vm5215_vm12 = vmor %vm5203_vm8, %vm1689_vm6 }
  0x1a   :  { %4949 = vmatmul.mubr.msk.bf16.gmra.mrb[4].mxu0 %vm124_vm0, %v4970_v7  ;;  %v1280_v20 = vrot.slane %v1278_v14, 6  ;;  %v1283_v21 = vrot.slane %v1281_v15, 7  ;;  %v1629_v28 = vcombine.high %v4634_v22, %v4634_v22  ;;  %v4638_v32 = vld.sshfl [vmem:[#allocation2 + $0x78] sm:$0x12 pattern:$0x76325410]  ;;  %vm5222_vm13 = vmor %vm5208_vm11, %vm1217_vm9 }
  0x1b   :  { %4952 = vmatprep.mubr.msk.bf16.mxu0 %vm124_vm0, %v4971_v8  ;;  %v1224_v26 = vrot.slane %v1222_v18, 6  ;;  %v1227_v27 = vrot.slane %v1225_v19, 7  ;;  %v1287_v33 = vshll.u32 %v1189_v23, 16  ;;  %v1231_v34 = vshll.u32 %v1157_v24, 16  ;;  %vm5234_vm14 = vmor %vm5215_vm12, %vm1691_vm7 }
  0x1c   :  { %v1284_v29 = vor.u32 %v1283_v21, %v1280_v20  ;;  %v4642_v36 = vrot.slane %v4634_v22, 9  ;;  %v1695_v39 = vrot.slane %v1629_v28, 7  ;;  %v1661_v41 = vcombine.high %v4638_v32, %v4638_v32  ;;  %v4717_v42 = vld.sshfl [vmem:[#allocation2 + $0x14] sm:$0x13 pattern:$0x76325410]  ;;  %vm5244_vm15 = vmor %vm5222_vm13, %vm1219_vm10 }
  0x1d   :  { %v1228_v37 = vor.u32 %v1227_v27, %v1224_v26  ;;  %v3290_v43 = vshrl.u32 %v4717_v42, 16  ;;  %v3293_v44 = vshll.u32 %v4717_v42, 16  ;;  %v4733_v45 = vld.sshfl [vmem:[#allocation2 + $0x14] sm:$0x12 pattern:$0x76325410]  ;;  %v3214_v54 = vcombine.high %v4717_v42, %v4717_v42 }
  0x1e   :  { %v1285_v40 = vrot.slane %v1284_v29, 2  ;;  %v1289_v48 = vrot.slane %v1287_v33, 7  ;;  %v1233_v49 = vrot.slane %v1231_v34, 7  ;;  %v3678_v50 = vcombine.high %v4733_v45, %v4733_v45 }
  0x1f   :  { %v4721_v51 = vld.sshfl [vmem:[#allocation2 + $0x2c] sm:$0x13 pattern:$0x76325410]  ;;  %v1229_v53 = vrot.slane %v1228_v37, 2  ;;  %v3292_v55 = vrot.slane %v3290_v43, 6  ;;  %v5250_v5 = vsel %vm5234_vm14, %v4642_v36, %v1695_v39 }
  0x20   :  { %v3295_v56 = vrot.slane %v3293_v44, 7  ;;  %v4646_v58 = vrot.slane %v4638_v32, 9  ;;  %v1711_v59 = vrot.slane %v1661_v41, 7  ;;  %v3346_v60 = vshrl.u32 %v4721_v51, 16 }
  0x21   :  { %v3349_v61 = vshll.u32 %v4721_v51, 16  ;;  %v4741_v63 = vrot.slane %v4733_v45, 9  ;;  %v3725_v0 = vrot.slane %v3678_v50, 7  ;;  %v3246_v1 = vcombine.high %v4721_v51, %v4721_v51 }
  0x22   :  { %4953 = vmatmul.mubr.msk.bf16.gmra.mrb[8].mxu0 %vm124_vm0, %v4972_v9  ;;  %v3296_v6 = vor.u32 %v3295_v56, %v3292_v55  ;;  %v5255_v9 = vsel %vm5244_vm15, %v1285_v40, %v1289_v48  ;;  %v5261_v12 = vld.sshfl [vmem:[#allocation2 + $0x2c] sm:$0x12 pattern:$0x76325410]  ;;  %v5266_v15 = vsel %vm5234_vm14, %v4646_v58, %v1711_v59  ;;  %v3348_v16 = vrot.slane %v3346_v60, 6 }
  0x23   :  { %4956 = vmatprep.mubr.msk.bf16.mxu0 %vm124_vm0, %v4973_v10  ;;  %v5259_v10 = vsel %vm5244_vm15, %v1229_v53, %v1233_v49  ;;  %v3351_v18 = vrot.slane %v3349_v61, 7  ;;  %v5271_v22 = vsel %vm5234_vm14, %v4741_v63, %v3725_v0  ;;  %v5273_v23 = vshll.u32 %v3246_v1, 16 }
  0x24   :  { %v3297_v27 = vrot.slane %v3296_v6, 2  ;;  %vm509_vm5 = vsmask.f32 2306  ;;  %v3710_v32 = vcombine.high %v5261_v12, %v5261_v12  ;;  %v4745_v36 = vrot.slane %v5261_v12, 9 }
  0x25   :  { %v3352_v31 = vor.u32 %v3351_v18, %v3348_v16  ;;  %v3357_v35 = vrot.slane %v5273_v23, 7  ;;  %v523_v16 = vld [vmem:[#allocation2 + $0x1c] sm:$0x7]  ;;  %vm5316_vm8 = vmand %vm302_vm1, %vm509_vm5 }
  0x26   :  { %v5293_v51 = vrot.slane %v3710_v32, 7 }
  0x27   :  { %v5291_v50 = vrot.slane %v3352_v31, 2 }
  0x2a   :  { %4957 = vmatmul.mubr.msk.bf16.gmra.mrb[12].mxu0 %vm124_vm0, %v4974_v11  ;;  %v3299_v11 = vshll.u32 %v3214_v54, 16 }
  0x2c   :  { %v3301_v29 = vrot.slane %v3299_v11, 7 }
  0x2e   :  { %v5285_v46 = vsel %vm5244_vm15, %v3297_v27, %v3301_v29  ;;  %v529_v27 = vld [vmem:[#allocation2 + $0x24] sm:$0x7] }
  0xe5   :  { %v4946_v2 = vpop.f32.mrb[0].mxu0 }
  0xe6   :  { %v192_v7 = vadd.f32 %v4946_v2, %v5229_v57  ;;  %v183_v8 = vpop.f32.mrb[1].mxu0 }
  0xe7   :  { %v184_v13 = vadd.f32 %v5229_v57, %v183_v8  ;;  %v4947_v14 = vpop.f32.mrb[2].mxu0 }
  0xe8   :  { %v264_v19 = vmul.f32 0.2, %v192_v7  ;;  %v195_v20 = vadd.f32 %v4947_v14, %v5229_v57  ;;  %v186_v21 = vpop.f32.mrb[3].mxu0  ;;  %vm248_vm2 = vcmp.gt.f32.partialorder %v192_v7, 0.0 }
  0xe9   :  { %v262_v24 = vmul.f32 0.2, %v184_v13  ;;  %v187_v26 = vadd.f32 %v5229_v57, %v186_v21  ;;  %vm246_vm3 = vcmp.gt.f32.partialorder %v184_v13, 0.0 }
  0xea   :  { %vm249_vm4 = vcmp.gt.f32.partialorder %v195_v20, 0.0  ;;  %v265_v28 = vmul.f32 0.2, %v195_v20  ;;  %v280_v33 = vsel %vm248_vm2, %v192_v7, %v264_v19 }
  0xeb   :  { %vm247_vm6 = vcmp.gt.f32.partialorder %v187_v26, 0.0  ;;  %v263_v30 = vmul.f32 0.2, %v187_v26  ;;  %v278_v37 = vsel %vm246_vm3, %v184_v13, %v262_v24 }
  0xec   :  { %v281_v34 = vsel %vm249_vm4, %v195_v20, %v265_v28 }
  0xed   :  { %v295_v38 = vpack.c.bf16 %v281_v34, %v280_v33  ;;  %v4611_v39 = vpack.c.bf16 %v281_v34, %v281_v34  ;;  %v279_v40 = vsel %vm247_vm6, %v187_v26, %v263_v30  ;;  %v4950_v41 = vpop.f32.mrb[4].mxu0  ;;  %vm1373_vm6 = vcmask 1048064  }
  0xee   :  { %v294_v42 = vpack.c.bf16 %v279_v40, %v278_v37  ;;  %v4610_v43 = vpack.c.bf16 %v279_v40, %v279_v40  ;;  %v5281_v44 = vadd.f32 %v4950_v41, %v5229_v57  ;;  %v199_v45 = vpop.f32.mrb[5].mxu0  ;;  %v526_v40 = vld [vmem:[#allocation2 + $0x20] sm:$0x7] }
  0xef   :  { %v377_v47 = vrot.slane %v295_v38, %v5239_v3  ;;  %v384_v48 = vrot.slane %v4611_v39, %v5239_v3  ;;  %v5289_v49 = vpop.f32.mrb[6].mxu0  ;;  %v5301_v55 = vadd.f32 %v5229_v57, %v199_v45  ;;  %v532_v45 = vld [vmem:[#allocation2 + $0x28] sm:$0x7] }
  0xf0   :  { %v360_v52 = vrot.slane %v294_v42, %v5239_v3  ;;  %v367_v53 = vrot.slane %v4610_v43, %v5239_v3  ;;  %v5298_v54 = vmul.f32 0.2, %v5281_v44  ;;  %v5303_v56 = vpop.f32.mrb[7].mxu0  ;;  %vm252_vm7 = vcmp.gt.f32.partialorder %v5281_v44, 0.0 }
  0xf1   :  { %v385_v58 = vcombine.high %v377_v47, %v377_v47  ;;  %v386_v59 = vcombine.high %v384_v48, %v384_v48  ;;  %v421_v60 = vrot.slane %v377_v47, %v5239_v3  ;;  %v435_v61 = vrot.slane %v384_v48, %v5239_v3 }
  0xf2   :  { %v368_v63 = vcombine.high %v360_v52, %v360_v52  ;;  %v369_v0 = vcombine.high %v367_v53, %v367_v53  ;;  %v393_v1 = vrot.slane %v360_v52, %v5239_v3  ;;  %v407_v2 = vrot.slane %v367_v53, %v5239_v3 }
  0xf3   :  { %v428_v6 = vrot.slane %v385_v58, %v5239_v3  ;;  %v442_v7 = vrot.slane %v386_v59, %v5239_v3  ;;  %v472_v8 = vshrl.u32 %v421_v60, 16  ;;  %v475_v11 = vshll.u32 %v421_v60, 16 }
  0xf4   :  { %v486_v13 = vshrl.u32 %v435_v61, 16  ;;  %v489_v14 = vshll.u32 %v435_v61, 16  ;;  %v400_v18 = vrot.slane %v368_v63, %v5239_v3  ;;  %v414_v19 = vrot.slane %v369_v0, %v5239_v3  ;;  %v511_v63 = vld [vmem:[#allocation2 + $0x4] sm:$0x7] }
  0xf5   :  { %v474_v20 = vrot.slane %v472_v8, 7  ;;  %v479_v21 = vshrl.u32 %v428_v6, 16  ;;  %v482_v24 = vshll.u32 %v428_v6, 16  ;;  %v493_v26 = vshrl.u32 %v442_v7, 16  ;;  %v4954_v28 = vpop.f32.mrb[8].mxu0 }
  0xf6   :  { %v488_v29 = vrot.slane %v486_v13, 7  ;;  %v496_v30 = vshll.u32 %v442_v7, 16  ;;  %v444_v32 = vshrl.u32 %v393_v1, 16  ;;  %v447_v33 = vshll.u32 %v393_v1, 16  ;;  %v215_v34 = vpop.f32.mrb[9].mxu0 }
  0xf7   :  { %v477_v37 = vor.u32 %v475_v11, %v474_v20  ;;  %v481_v38 = vrot.slane %v479_v21, 7  ;;  %v495_v39 = vrot.slane %v493_v26, 7  ;;  %v451_v41 = vshrl.u32 %v400_v18, 16  ;;  %v4955_v42 = vpop.f32.mrb[10].mxu0  ;;  %v514_v8 = vld [vmem:[#allocation2 + $0x8] sm:$0x7] }
  0xf8   :  { %v491_v43 = vor.u32 %v489_v14, %v488_v29  ;;  %v446_v47 = vrot.slane %v444_v32, 7  ;;  %v454_v48 = vshll.u32 %v400_v18, 16  ;;  %v458_v52 = vshrl.u32 %v407_v2, 16  ;;  %v218_v53 = vpop.f32.mrb[11].mxu0  ;;  %v520_v32 = vld [vmem:[#allocation2 + $0x10] sm:$0x7] }
  0xf9   :  { %v484_v58 = vor.u32 %v482_v24, %v481_v38  ;;  %v498_v59 = vor.u32 %v496_v30, %v495_v39  ;;  %v524_v60 = vsel %vm5316_vm8, %v477_v37, %v523_v16  ;;  %v453_v61 = vrot.slane %v451_v41, 7  ;;  %v517_v16 = vld [vmem:[#allocation2 + $0xc] sm:$0x7] }
  0xfa   :  { %525 = vst [vmem:[#allocation2 + $0x1c] sm:$0x7] %v524_v60  ;;  %v530_v0 = vsel %vm5316_vm8, %v491_v43, %v529_v27  ;;  %v449_v1 = vor.u32 %v447_v33, %v446_v47  ;;  %v460_v6 = vrot.slane %v458_v52, 7  ;;  %v461_v7 = vshll.u32 %v407_v2, 16 }
  0xfb   :  { %v527_v11 = vsel %vm5316_vm8, %v484_v58, %v526_v40  ;;  %531 = vst [vmem:[#allocation2 + $0x24] sm:$0x7] %v530_v0  ;;  %v533_v13 = vsel %vm5316_vm8, %v498_v59, %v532_v45  ;;  %v456_v14 = vor.u32 %v454_v48, %v453_v61  ;;  %v465_v18 = vshrl.u32 %v414_v19, 16 }
  0xfc   :  { %528 = vst [vmem:[#allocation2 + $0x20] sm:$0x7] %v527_v11  ;;  %534 = vst [vmem:[#allocation2 + $0x28] sm:$0x7] %v533_v13  ;;  %v463_v20 = vor.u32 %v461_v7, %v460_v6  ;;  %v468_v21 = vshll.u32 %v414_v19, 16  ;;  %v512_v24 = vsel %vm5316_vm8, %v449_v1, %v511_v63  ;;  %v284_v2 = vsel %vm252_vm7, %v5281_v44, %v5298_v54 }
  0xfd   :  { %v467_v26 = vrot.slane %v465_v18, 7  ;;  %513 = vst [vmem:[#allocation2 + $0x4] sm:$0x7] %v512_v24  ;;  %v515_v27 = vsel %vm5316_vm8, %v456_v14, %v514_v8  ;;  %vm250_vm1 = vcmp.gt.f32.partialorder %v5301_v55, 0.0  ;;  %v266_v29 = vmul.f32 0.2, %v5301_v55 }
  0xfe   :  { %v5338_v30 = vpop.f32.mrb[12].mxu0  ;;  %516 = vst [vmem:[#allocation2 + $0x8] sm:$0x7] %v515_v27  ;;  %v518_v19 = vsel %vm5316_vm8, %v463_v20, %v517_v16  ;;  %v211_v33 = vadd.f32 %v5289_v49, %v5229_v57  ;;  %v203_v44 = vadd.f32 %v5229_v57, %v5303_v56  ;;  %v224_v54 = vadd.f32 %v4954_v28, %v5229_v57 }
  0xff   :  { %v5347_v37 = vpop.f32.mrb[13].mxu0  ;;  %v470_v38 = vor.u32 %v468_v21, %v467_v26  ;;  %519 = vst [vmem:[#allocation2 + $0xc] sm:$0x7] %v518_v19  ;;  %v282_v39 = vsel %vm250_vm1, %v5301_v55, %v266_v29  ;;  %v216_v40 = vadd.f32 %v5229_v57, %v215_v34  ;;  %v227_v41 = vadd.f32 %v4955_v42, %v5229_v57 }
 0x100   :  { %v5352_v43 = vpop.f32.mrb[14].mxu0  ;;  %vm253_vm9 = vcmp.gt.f32.partialorder %v211_v33, 0.0  ;;  %v269_v45 = vmul.f32 0.2, %v211_v33  ;;  %vm251_vm10 = vcmp.gt.f32.partialorder %v203_v44, 0.0  ;;  %vm256_vm11 = vcmp.gt.f32.partialorder %v224_v54, 0.0 }
 0x101   :  { %v267_v49 = vmul.f32 0.2, %v203_v44  ;;  %v521_v56 = vsel %vm5316_vm8, %v470_v38, %v520_v32  ;;  %v272_v28 = vmul.f32 0.2, %v224_v54  ;;  %vm254_vm12 = vcmp.gt.f32.partialorder %v216_v40, 0.0 }
 0x102   :  { %522 = vst [vmem:[#allocation2 + $0x10] sm:$0x7] %v521_v56  ;;  %v285_v47 = vsel %vm253_vm9, %v211_v33, %v269_v45  ;;  %v270_v55 = vmul.f32 0.2, %v216_v40  ;;  %vm257_vm13 = vcmp.gt.f32.partialorder %v227_v41, 0.0  ;;  %v5359_v61 = vadd.f32 %v5229_v57, %v218_v53 }
 0x103   :  { %v283_v48 = vsel %vm251_vm10, %v203_v44, %v267_v49  ;;  %v297_v34 = vpack.c.bf16 %v285_v47, %v284_v2  ;;  %v4613_v52 = vpack.c.bf16 %v285_v47, %v285_v47  ;;  %v5356_v59 = vsel %vm256_vm11, %v224_v54, %v272_v28  ;;  %v704_v33 = vld [vmem:[#allocation2 + $0x4c] sm:$0x7]  ;;  %v710_v45 = vld [vmem:[#allocation2 + $0x54] sm:$0x7]  ;;  %v707_v28 = vld [vmem:[#allocation2 + $0x50] sm:$0x7] }
 0x104   :  { %v296_v42 = vpack.c.bf16 %v283_v48, %v282_v39  ;;  %v4612_v58 = vpack.c.bf16 %v283_v48, %v283_v48  ;;  %v273_v60 = vmul.f32 0.2, %v227_v41  ;;  %v5361_v63 = vld.sshfl [vmem:[#allocation2 + $0x4] sm:$0x12 pattern:$0x76325410]  ;;  %v5368_v0 = vsel %vm5244_vm15, %v5291_v50, %v3357_v35 }
 0x105   :  { %v561_v1 = vrot.slane %v297_v34, %v5239_v3  ;;  %v568_v6 = vrot.slane %v4613_v52, %v5239_v3  ;;  %v5375_v57 = vsel %vm254_vm12, %v216_v40, %v270_v55  ;;  %v5380_v23 = vmul.f32 0.2, %v5359_v61  ;;  %v5384_v50 = vpop.f32.mrb[15].mxu0  ;;  %v713_v47 = vld [vmem:[#allocation2 + $0x58] sm:$0x7] }
 0x106   :  { %v544_v7 = vrot.slane %v296_v42, %v5239_v3  ;;  %v551_v8 = vrot.slane %v4612_v58, %v5239_v3  ;;  %v5377_v53 = vsel %vm257_vm13, %v227_v41, %v273_v60  ;;  %v2308_v35 = vcombine.high %v5361_v63, %v5361_v63  ;;  %v4975_v60 = vld [vmem:[%s6170_s3 + $0xc0] sm:$0xff]  }
 0x107   :  { %v569_v11 = vcombine.high %v561_v1, %v561_v1  ;;  %v570_v13 = vcombine.high %v568_v6, %v568_v6  ;;  %v605_v14 = vrot.slane %v561_v1, %v5239_v3  ;;  %v619_v18 = vrot.slane %v568_v6, %v5239_v3  ;;  %4852 = vmatprep.subr.bf16.mxu0 %v4975_v60 }
 0x108   :  { %v552_v16 = vcombine.high %v544_v7, %v544_v7  ;;  %v553_v20 = vcombine.high %v551_v8, %v551_v8  ;;  %v577_v21 = vrot.slane %v544_v7, %v5239_v3  ;;  %v591_v24 = vrot.slane %v551_v8, %v5239_v3 }
 0x109   :  { %vm255_vm2 = vcmp.gt.f32.partialorder %v5359_v61, 0.0  ;;  %v612_v2 = vrot.slane %v569_v11, %v5239_v3  ;;  %v626_v26 = vrot.slane %v570_v13, %v5239_v3  ;;  %v656_v27 = vshrl.u32 %v605_v14, 16  ;;  %v4976_v11 = vld [vmem:[%s6170_s3 + $0x80] sm:$0xff]  }
 0x10a   :  { %v659_v29 = vshll.u32 %v605_v14, 16  ;;  %v670_v19 = vshrl.u32 %v619_v18, 16  ;;  %v673_v32 = vshll.u32 %v619_v18, 16  ;;  %v584_v44 = vrot.slane %v552_v16, %v5239_v3  ;;  %4853 = vmatpush3.bf16.msra.mxu0 %v4976_v11 }
 0x10b   :  { %v5395_v54 = vrot.slane %v553_v20, %v5239_v3  ;;  %v658_v38 = vrot.slane %v656_v27, 7  ;;  %v663_v39 = vshrl.u32 %v612_v2, 16  ;;  %v666_v40 = vshll.u32 %v612_v2, 16  ;;  %v692_v20 = vld [vmem:[#allocation2 + $0x34] sm:$0x7] }
 0x10c   :  { %v677_v41 = vshrl.u32 %v626_v26, 16  ;;  %v672_v49 = vrot.slane %v670_v19, 7  ;;  %v680_v56 = vshll.u32 %v626_v26, 16  ;;  %v628_v48 = vshrl.u32 %v577_v21, 16  ;;  %v695_v19 = vld [vmem:[#allocation2 + $0x38] sm:$0x7] }
 0x10d   :  { %v631_v55 = vshll.u32 %v577_v21, 16  ;;  %v661_v34 = vor.u32 %v659_v29, %v658_v38  ;;  %v665_v52 = vrot.slane %v663_v39, 7  ;;  %v635_v58 = vshrl.u32 %v584_v44, 16  ;;  %v4977_v21 = vld [vmem:[%s6170_s3 + $0xc8] sm:$0xff]  }
 0x10e   :  { %v679_v42 = vrot.slane %v677_v41, 7  ;;  %v675_v1 = vor.u32 %v673_v32, %v672_v49  ;;  %v630_v6 = vrot.slane %v628_v48, 7  ;;  %v638_v7 = vshll.u32 %v584_v44, 16  ;;  %v698_v32 = vld [vmem:[#allocation2 + $0x3c] sm:$0x7]  ;;  %4854 = vmatprep.subr.bf16.mxu0 %v4977_v21 }
 0x10f   :  { %v642_v8 = vshrl.u32 %v591_v24, 16  ;;  %v668_v13 = vor.u32 %v666_v40, %v665_v52  ;;  %v705_v18 = vsel %vm5316_vm8, %v661_v34, %v704_v33  ;;  %v637_v16 = vrot.slane %v635_v58, 7  ;;  %v5415_v40 = vld.sshfl [vmem:[#allocation2 + $0x8] sm:$0x12 pattern:$0x76325410] }
 0x110   :  { %v682_v14 = vor.u32 %v680_v56, %v679_v42  ;;  %706 = vst [vmem:[#allocation2 + $0x4c] sm:$0x7] %v705_v18  ;;  %v711_v2 = vsel %vm5316_vm8, %v675_v1, %v710_v45  ;;  %v633_v26 = vor.u32 %v631_v55, %v630_v6  ;;  %v645_v29 = vshll.u32 %v591_v24, 16  ;;  %v4978_v24 = vld [vmem:[%s6170_s3 + $0x88] sm:$0xff]   ;;  %v701_v42 = vld [vmem:[#allocation2 + $0x40] sm:$0x7] }
 0x111   :  { %v644_v27 = vrot.slane %v642_v8, 7  ;;  %v708_v33 = vsel %vm5316_vm8, %v668_v13, %v707_v28  ;;  %712 = vst [vmem:[#allocation2 + $0x54] sm:$0x7] %v711_v2  ;;  %v640_v38 = vor.u32 %v638_v7, %v637_v16  ;;  %v649_v39 = vshrl.u32 %v5395_v54, 16  ;;  %4855 = vmatpush3.bf16.msra.mxu0 %v4978_v24 }
 0x112   :  { %v714_v44 = vsel %vm5316_vm8, %v682_v14, %v713_v47  ;;  %709 = vst [vmem:[#allocation2 + $0x50] sm:$0x7] %v708_v33  ;;  %v652_v45 = vshll.u32 %v5395_v54, 16  ;;  %v693_v49 = vsel %vm5316_vm8, %v633_v26, %v692_v20  ;;  %v299_v56 = vpack.c.bf16 %v5377_v53, %v5356_v59  ;;  %v4979_v47 = vld [vmem:[%s6170_s3 + $0xd0] sm:$0xff]   ;;  %v885_v33 = vld [vmem:[#allocation2 + $0x7c] sm:$0x7] }
 0x113   :  { %715 = vst [vmem:[#allocation2 + $0x58] sm:$0x7] %v714_v44  ;;  %v647_v41 = vor.u32 %v645_v29, %v644_v27  ;;  %v5425_v28 = vld.sshfl [vmem:[#allocation2 + $0xc] sm:$0x12 pattern:$0x76325410]  ;;  %v696_v55 = vsel %vm5316_vm8, %v640_v38, %v695_v19  ;;  %v4615_v54 = vpack.c.bf16 %v5377_v53, %v5377_v53  ;;  %v287_v34 = vsel %vm255_vm2, %v5359_v61, %v5380_v23 }
 0x114   :  { %v651_v48 = vrot.slane %v649_v39, 7  ;;  %694 = vst [vmem:[#allocation2 + $0x34] sm:$0x7] %v693_v49  ;;  %697 = vst [vmem:[#allocation2 + $0x38] sm:$0x7] %v696_v55  ;;  %v742_v58 = vrot.slane %v299_v56, %v5239_v3  ;;  %v298_v60 = vpack.c.bf16 %v287_v34, %v5375_v57  ;;  %v4614_v1 = vpack.c.bf16 %v287_v34, %v287_v34  ;;  %v4980_v53 = vld [vmem:[%s6170_s3 + $0x90] sm:$0xff]  }
 0x115   :  { %v5438_v59 = vld.sshfl [vmem:[#allocation2 + $0x10] sm:$0x12 pattern:$0x76325410]  ;;  %v699_v52 = vsel %vm5316_vm8, %v647_v41, %v698_v32  ;;  %v749_v61 = vrot.slane %v4615_v54, %v5239_v3  ;;  %v2316_v23 = vcombine.high %v5415_v40, %v5415_v40  ;;  %v2324_v7 = vcombine.high %v5425_v28, %v5425_v28  ;;  %4856 = vmatprep.subr.bf16.mxu0 %v4979_v47  ;;  %v891_v41 = vld [vmem:[#allocation2 + $0x84] sm:$0x7] }
 0x116   :  { %v654_v6 = vor.u32 %v652_v45, %v651_v48  ;;  %700 = vst [vmem:[#allocation2 + $0x3c] sm:$0x7] %v699_v52  ;;  %v750_v8 = vcombine.high %v742_v58, %v742_v58  ;;  %v786_v57 = vrot.slane %v742_v58, %v5239_v3  ;;  %v725_v11 = vrot.slane %v298_v60, %v5239_v3  ;;  %v4981_v49 = vld [vmem:[%s6170_s3 + $0xd8] sm:$0xff]   ;;  %v888_v55 = vld [vmem:[#allocation2 + $0x80] sm:$0x7] }
 0x117   :  { %v732_v13 = vrot.slane %v4614_v1, %v5239_v3  ;;  %v751_v18 = vcombine.high %v749_v61, %v749_v61  ;;  %v800_v16 = vrot.slane %v749_v61, %v5239_v3  ;;  %v2332_v20 = vcombine.high %v5438_v59, %v5438_v59  ;;  %4857 = vmatpush3.bf16.msra.mxu0 %v4980_v53  ;;  %v4982_v34 = vld [vmem:[%s6170_s3 + $0x98] sm:$0xff]   ;;  %v894_v58 = vld [vmem:[#allocation2 + $0x88] sm:$0x7]  ;;  %v4983_v53 = vld [vmem:[%s6170_s3 + $0x40] sm:$0xff]  }
 0x118   :  { %v702_v14 = vsel %vm5316_vm8, %v654_v6, %v701_v42  ;;  %v793_v21 = vrot.slane %v750_v8, %v5239_v3  ;;  %v837_v2 = vshrl.u32 %v786_v57, 16  ;;  %v840_v26 = vshll.u32 %v786_v57, 16  ;;  %4858 = vmatprep.subr.bf16.mxu0 %v4981_v49  ;;  %4824 = vmatprep.subr.bf16.mxu1 %v4983_v53 }
 0x119   :  { %703 = vst [vmem:[#allocation2 + $0x40] sm:$0x7] %v702_v14  ;;  %v733_v27 = vcombine.high %v725_v11, %v725_v11  ;;  %v807_v29 = vrot.slane %v751_v18, %v5239_v3  ;;  %v851_v19 = vshrl.u32 %v800_v16, 16  ;;  %v854_v32 = vshll.u32 %v800_v16, 16 }
 0x11a   :  { %v734_v44 = vcombine.high %v732_v13, %v732_v13  ;;  %v839_v38 = vrot.slane %v837_v2, 7  ;;  %v844_v39 = vshrl.u32 %v793_v21, 16  ;;  %v847_v24 = vshll.u32 %v793_v21, 16  ;;  %v873_v21 = vld [vmem:[#allocation2 + $0x64] sm:$0x7] }
 0x11b   :  { %v758_v45 = vrot.slane %v725_v11, %v5239_v3  ;;  %v853_v56 = vrot.slane %v851_v19, 7  ;;  %v858_v47 = vshrl.u32 %v807_v29, 16  ;;  %v861_v48 = vshll.u32 %v807_v29, 16  ;;  %4859 = vmatpush3.bf16.msra.mxu0 %v4982_v34  ;;  %v4984_v11 = vld [vmem:[%s6170_s3] sm:$0xff]   ;;  %v876_v19 = vld [vmem:[#allocation2 + $0x68] sm:$0x7] }
 0x11c   :  { %v765_v54 = vrot.slane %v733_v27, %v5239_v3  ;;  %v842_v52 = vor.u32 %v840_v26, %v839_v38  ;;  %v846_v42 = vrot.slane %v844_v39, 7  ;;  %v772_v60 = vrot.slane %v732_v13, %v5239_v3  ;;  %4825 = vmatpush3.bf16.msra.mxu1 %v4984_v11  ;;  %v879_v39 = vld [vmem:[#allocation2 + $0x6c] sm:$0x7] }
 0x11d   :  { %v779_v1 = vrot.slane %v734_v44, %v5239_v3  ;;  %v856_v6 = vor.u32 %v854_v32, %v853_v56  ;;  %v860_v61 = vrot.slane %v858_v47, 7  ;;  %v809_v8 = vshrl.u32 %v758_v45, 16  ;;  %v882_v47 = vld [vmem:[#allocation2 + $0x70] sm:$0x7] }
 0x11e   :  { %v812_v57 = vshll.u32 %v758_v45, 16  ;;  %v849_v14 = vor.u32 %v847_v24, %v846_v42  ;;  %v886_v13 = vsel %vm5316_vm8, %v842_v52, %v885_v33  ;;  %v816_v18 = vshrl.u32 %v765_v54, 16  ;;  %v4985_v24 = vld [vmem:[%s6170_s3 + $0xe0] sm:$0xff]  }
 0x11f   :  { %v819_v16 = vshll.u32 %v765_v54, 16  ;;  %v863_v2 = vor.u32 %v861_v48, %v860_v61  ;;  %887 = vst [vmem:[#allocation2 + $0x7c] sm:$0x7] %v886_v13  ;;  %v892_v26 = vsel %vm5316_vm8, %v856_v6, %v891_v41  ;;  %v811_v27 = vrot.slane %v809_v8, 7  ;;  %4860 = vmatprep.subr.bf16.mxu0 %v4985_v24 }
 0x120   :  { %v823_v29 = vshrl.u32 %v772_v60, 16  ;;  %v889_v32 = vsel %vm5316_vm8, %v849_v14, %v888_v55  ;;  %893 = vst [vmem:[#allocation2 + $0x84] sm:$0x7] %v892_v26  ;;  %v818_v44 = vrot.slane %v816_v18, 7  ;;  %v826_v38 = vshll.u32 %v772_v60, 16  ;;  %v4987_v14 = vld [vmem:[%s6170_s3 + $0x48] sm:$0xff]  }
 0x121   :  { %v830_v33 = vshrl.u32 %v779_v1, 16  ;;  %890 = vst [vmem:[#allocation2 + $0x80] sm:$0x7] %v889_v32  ;;  %v895_v41 = vsel %vm5316_vm8, %v863_v2, %v894_v58  ;;  %v814_v45 = vor.u32 %v812_v57, %v811_v27  ;;  %v833_v56 = vshll.u32 %v779_v1, 16  ;;  %v4986_v58 = vld [vmem:[%s6170_s3 + $0xa0] sm:$0xff]   ;;  %4826 = vmatprep.subr.bf16.mxu1 %v4987_v14  ;;  %v4988_v27 = vld [vmem:[%s6170_s3 + $0x8] sm:$0xff]  }
 0x122   :  { %v825_v49 = vrot.slane %v823_v29, 7  ;;  %v4650_v48 = vld.sshfl [vmem:[#allocation2 + $0x4] sm:$0x13 pattern:$0x76325410]  ;;  %v821_v55 = vor.u32 %v819_v16, %v818_v44  ;;  %v4674_v34 = vrot.slane %v5361_v63, 9  ;;  %4861 = vmatpush3.bf16.msra.mxu0 %v4986_v58  ;;  %4827 = vmatpush3.bf16.msra.mxu1 %v4988_v27 }
 0x123   :  { %896 = vst [vmem:[#allocation2 + $0x88] sm:$0x7] %v895_v41  ;;  %v832_v54 = vrot.slane %v830_v33, 7  ;;  %v2367_v52 = vrot.slane %v2308_v35, 7  ;;  %v874_v53 = vsel %vm5316_vm8, %v814_v45, %v873_v21  ;;  %v4675_v6 = vrot.slane %v5415_v40, 9  ;;  %v4989_v41 = vld [vmem:[%s6170_s3 + $0xe8] sm:$0xff]  }
 0x124   :  { %v4651_v42 = vld.sshfl [vmem:[#allocation2 + $0x8] sm:$0x13 pattern:$0x76325410]  ;;  %v828_v1 = vor.u32 %v826_v38, %v825_v49  ;;  %v2371_v61 = vrot.slane %v2316_v23, 7  ;;  %v877_v35 = vsel %vm5316_vm8, %v821_v55, %v876_v19  ;;  %v4676_v57 = vrot.slane %v5425_v28, 9  ;;  %4862 = vmatprep.subr.bf16.mxu0 %v4989_v41 }
 0x125   :  { %v5493_v60 = vld.sshfl [vmem:[#allocation2 + $0xc] sm:$0x13 pattern:$0x76325410]  ;;  %v835_v63 = vor.u32 %v833_v56, %v832_v54  ;;  %875 = vst [vmem:[#allocation2 + $0x64] sm:$0x7] %v874_v53  ;;  %v2368_v8 = vsel %vm5234_vm14, %v4674_v34, %v2367_v52  ;;  %v1844_v26 = vcombine.high %v4650_v48, %v4650_v48 }
 0x126   :  { %v5509_v11 = vld.sshfl [vmem:[#allocation2 + $0x10] sm:$0x13 pattern:$0x76325410]  ;;  %878 = vst [vmem:[#allocation2 + $0x68] sm:$0x7] %v877_v35  ;;  %v880_v40 = vsel %vm5316_vm8, %v828_v1, %v879_v39  ;;  %v5518_v23 = vsel %vm5234_vm14, %v4675_v6, %v2371_v61  ;;  %v1860_v29 = vcombine.high %v5493_v60, %v5493_v60 }
 0x127   :  { %v2375_v13 = vrot.slane %v2324_v7, 7  ;;  %v4677_v18 = vrot.slane %v5438_v59, 9  ;;  %881 = vst [vmem:[#allocation2 + $0x6c] sm:$0x7] %v880_v40  ;;  %v883_v16 = vsel %vm5316_vm8, %v835_v63, %v882_v47  ;;  %v2379_v21 = vrot.slane %v2332_v20, 7  ;;  %v4990_v52 = vld [vmem:[%s6170_s3 + $0xa8] sm:$0xff]  }
 0x128   :  { %v2397_v2 = vcombine.low %v2368_v8, %v5518_v23  ;;  %884 = vst [vmem:[#allocation2 + $0x70] sm:$0x7] %v883_v16  ;;  %v1852_v7 = vcombine.high %v4651_v42, %v4651_v42  ;;  %v1868_v59 = vcombine.high %v5509_v11, %v5509_v11  ;;  %v1902_v32 = vshrl.u32 %v4650_v48, 16  ;;  %v4991_v6 = vld [vmem:[%s6170_s3 + $0x50] sm:$0xff]   ;;  %4863 = vmatpush3.bf16.msra.mxu0 %v4990_v52 }
 0x129   :  { %v5535_v28 = vsel %vm5234_vm14, %v4676_v57, %v2375_v13  ;;  %v5543_v20 = vsel %vm5234_vm14, %v4677_v18, %v2379_v21  ;;  %v1905_v44 = vshll.u32 %v4650_v48, 16  ;;  %v1911_v33 = vshll.u32 %v1844_v26, 16  ;;  %4828 = vmatprep.subr.bf16.mxu1 %v4991_v6  ;;  %v4995_v52 = vld [vmem:[%s6170_s3 + $0xf0] sm:$0xff]  }
 0x12a   :  { %v2405_v19 = vrot.slane %v2397_v2, %v5239_v3  ;;  %v2398_v38 = vcombine.low %v5535_v28, %v5543_v20  ;;  %v1916_v39 = vshrl.u32 %v4651_v42, 16  ;;  %v1919_v24 = vshll.u32 %v4651_v42, 16  ;;  %4864 = vmatprep.subr.bf16.mxu0 %v4995_v52 }
 0x12b   :  { %v1904_v45 = vrot.slane %v1902_v32, 6  ;;  %v1907_v49 = vrot.slane %v1905_v44, 7  ;;  %v1925_v56 = vshll.u32 %v1852_v7, 16  ;;  %v1930_v47 = vshrl.u32 %v5493_v60, 16 }
 0x12c   :  { %v2412_v55 = vrot.slane %v2398_v38, %v5239_v3  ;;  %v1913_v54 = vrot.slane %v1911_v33, 7  ;;  %v1918_v48 = vrot.slane %v1916_v39, 6  ;;  %v1921_v34 = vrot.slane %v1919_v24, 7 }
 0x12d   :  { %v1908_v42 = vor.u32 %v1907_v49, %v1904_v45  ;;  %v1927_v58 = vrot.slane %v1925_v56, 7  ;;  %v1932_v1 = vrot.slane %v1930_v47, 6  ;;  %v1933_v53 = vshll.u32 %v5493_v60, 16  ;;  %v4994_v47 = vld [vmem:[%s6170_s3 + $0x10] sm:$0xff]  }
 0x12e   :  { %v2413_v61 = vcombine.low %v2405_v19, %v2412_v55  ;;  %v1922_v63 = vor.u32 %v1921_v34, %v1918_v48  ;;  %v1939_v35 = vshll.u32 %v1860_v29, 16  ;;  %v1944_v8 = vshrl.u32 %v5509_v11, 16  ;;  %v4635_v57 = vld.sshfl [vmem:[#allocation2 + $0x64] sm:$0x12 pattern:$0x76325410]  ;;  %4829 = vmatpush3.bf16.msra.mxu1 %v4994_v47 }
 0x12f   :  { %v1909_v14 = vrot.slane %v1908_v42, 2  ;;  %v1935_v40 = vrot.slane %v1933_v53, 7  ;;  %v1947_v13 = vshll.u32 %v5509_v11, 16  ;;  %v1953_v18 = vshll.u32 %v1868_v59, 16 }
 0x130   :  { %2431 = vrot.lane.b32.xlu1 %v2413_v61, %s5074_s11  ;;  %v1923_v60 = vrot.slane %v1922_v63, 2  ;;  %v1941_v16 = vrot.slane %v1939_v35, 7  ;;  %v1946_v21 = vrot.slane %v1944_v8, 6  ;;  %v1637_v2 = vcombine.high %v4635_v57, %v4635_v57 }
 0x131   :  { %v1914_v26 = vsel %vm5244_vm15, %v1909_v14, %v1913_v54  ;;  %v1936_v27 = vor.u32 %v1935_v40, %v1932_v1  ;;  %v1949_v7 = vrot.slane %v1947_v13, 7  ;;  %v1955_v29 = vrot.slane %v1953_v18, 7  ;;  %v4636_v19 = vld.sshfl [vmem:[#allocation2 + $0x68] sm:$0x12 pattern:$0x76325410] }
 0x132   :  { %v4623_v32 = vld.sshfl [vmem:[#allocation2 + $0x7c] sm:$0x13 pattern:$0x76325410]  ;;  %v5567_v11 = vsel %vm5244_vm15, %v1923_v60, %v1927_v58  ;;  %v1645_v44 = vcombine.high %v4636_v19, %v4636_v19  ;;  %v4643_v38 = vrot.slane %v4635_v57, 9  ;;  %v1699_v33 = vrot.slane %v1637_v2, 7 }
 0x133   :  { %v4637_v59 = vld.sshfl [vmem:[#allocation2 + $0x6c] sm:$0x12 pattern:$0x76325410]  ;;  %v1937_v24 = vrot.slane %v1936_v27, 2  ;;  %v1950_v41 = vor.u32 %v1949_v7, %v1946_v21  ;;  %v2013_v45 = vcombine.low %v1914_v26, %v5567_v11  ;;  %v4644_v54 = vrot.slane %v4636_v19, 9 }
 0x134   :  { %v5569_v39 = vld.sshfl [vmem:[#allocation2 + $0x84] sm:$0x13 pattern:$0x76325410]  ;;  %v1653_v49 = vcombine.high %v4637_v59, %v4637_v59  ;;  %v5577_v55 = vsel %vm5234_vm14, %v4643_v38, %v1699_v33  ;;  %v1703_v48 = vrot.slane %v1645_v44, 7  ;;  %v4645_v34 = vrot.slane %v4637_v59, 9 }
 0x135   :  { %v4624_v56 = vld.sshfl [vmem:[#allocation2 + $0x80] sm:$0x13 pattern:$0x76325410]  ;;  %v5584_v42 = vsel %vm5244_vm15, %v1937_v24, %v1941_v16  ;;  %v1951_v58 = vrot.slane %v1950_v41, 2  ;;  %v2021_v1 = vrot.slane %v2013_v45, %v5239_v3  ;;  %v1725_v61 = vcombine.low %v5250_v5, %v5577_v55  ;;  %v4996_v13 = vld [vmem:[%s6170_s3 + $0xb0] sm:$0xff]  }
 0x136   :  { %v1707_v53 = vrot.slane %v1653_v49, 7  ;;  %v5589_v6 = vsel %vm5234_vm14, %v4644_v54, %v1703_v48  ;;  %v1197_v63 = vcombine.high %v4623_v32, %v4623_v32  ;;  %v1205_v35 = vcombine.high %v4624_v56, %v4624_v56  ;;  %v4997_v21 = vld [vmem:[%s6170_s3 + $0x58] sm:$0xff]   ;;  %v4620_v19 = vld.sshfl [vmem:[#allocation2 + $0x68] sm:$0x13 pattern:$0x76325410]  ;;  %4865 = vmatpush3.bf16.msra.mxu0 %v4996_v13 }
 0x137   :  { %v5595_v8 = vsel %vm5244_vm15, %v1951_v58, %v1955_v29  ;;  %v1213_v14 = vcombine.high %v5569_v39, %v5569_v39  ;;  %v1292_v40 = vshrl.u32 %v4623_v32, 16  ;;  %v1733_v60 = vrot.slane %v1725_v61, %v5239_v3  ;;  %v4619_v29 = vld.sshfl [vmem:[#allocation2 + $0x64] sm:$0x13 pattern:$0x76325410]  ;;  %4830 = vmatprep.subr.bf16.mxu1 %v4997_v21 }
 0x138   :  { %v5599_v57 = vsel %vm5234_vm14, %v4645_v34, %v1707_v53  ;;  %v2014_v5 = vcombine.low %v5584_v42, %v5595_v8  ;;  %v1295_v16 = vshll.u32 %v4623_v32, 16  ;;  %v1301_v26 = vshll.u32 %v1197_v63, 16  ;;  %v5616_v24 = vld.sshfl [vmem:[#allocation2 + $0x6c] sm:$0x13 pattern:$0x76325410] }
 0x139   :  { %v1726_v18 = vcombine.low %v5589_v6, %v5599_v57  ;;  %v1294_v2 = vrot.slane %v1292_v40, 6  ;;  %v1306_v27 = vshrl.u32 %v4624_v56, 16  ;;  %v1309_v7 = vshll.u32 %v4624_v56, 16  ;;  %v4998_v34 = vld [vmem:[%s6170_s3 + $0x18] sm:$0xff]  }
 0x13a   :  { %v2028_v59 = vrot.slane %v2014_v5, %v5239_v3  ;;  %v1297_v38 = vrot.slane %v1295_v16, 7  ;;  %v1315_v33 = vshll.u32 %v1205_v35, 16  ;;  %v1303_v32 = vrot.slane %v1301_v26, 7  ;;  %v4999_v63 = vld [vmem:[%s6170_s3 + $0xf8] sm:$0xff]   ;;  %4831 = vmatpush3.bf16.msra.mxu1 %v4998_v34 }
 0x13b   :  { %v1740_v44 = vrot.slane %v1726_v18, %v5239_v3  ;;  %v1308_v41 = vrot.slane %v1306_v27, 6  ;;  %v1311_v45 = vrot.slane %v1309_v7, 7  ;;  %v1320_v49 = vshrl.u32 %v5569_v39, 16  ;;  %v5000_v5 = vld [vmem:[%s6170_s3 + $0xb8] sm:$0xff]   ;;  %4866 = vmatprep.subr.bf16.mxu0 %v4999_v63  ;;  %v5001_v27 = vld [vmem:[%s6170_s3 + $0x60] sm:$0xff]  }
 0x13c   :  { %v2029_v47 = vcombine.low %v2021_v1, %v2028_v59  ;;  %v1298_v56 = vor.u32 %v1297_v38, %v1294_v2  ;;  %v1317_v48 = vrot.slane %v1315_v33, 7  ;;  %v1323_v53 = vshll.u32 %v5569_v39, 16  ;;  %4867 = vmatpush3.bf16.msra.mxu0 %v5000_v5  ;;  %v4654_v33 = vld.sshfl [vmem:[#allocation2 + $0x1c] sm:$0x13 pattern:$0x76325410]  ;;  %4832 = vmatprep.subr.bf16.mxu1 %v5001_v27 }
 0x13d   :  { %v1741_v54 = vcombine.low %v1733_v60, %v1740_v44  ;;  %v1312_v52 = vor.u32 %v1311_v45, %v1308_v41  ;;  %v1322_v58 = vrot.slane %v1320_v49, 6  ;;  %v1329_v61 = vshll.u32 %v1213_v14, 16 }
 0x13e   :  { %2047 = vrot.lane.b32.xlu1 %v2029_v47, %s5074_s11  ;;  %v1299_v1 = vrot.slane %v1298_v56, 2  ;;  %v1165_v35 = vcombine.high %v4619_v29, %v4619_v29  ;;  %v1173_v40 = vcombine.high %v4620_v19, %v4620_v19  ;;  %v1181_v13 = vcombine.high %v5616_v24, %v5616_v24  ;;  %v4655_v47 = vld.sshfl [vmem:[#allocation2 + $0x20] sm:$0x13 pattern:$0x76325410] }
 0x13f   :  { %1759 = vrot.lane.b32.xlu0 %v1741_v54, %s5074_s11  ;;  %v1313_v39 = vrot.slane %v1312_v52, 2  ;;  %v1325_v14 = vrot.slane %v1323_v53, 7  ;;  %v1331_v18 = vrot.slane %v1329_v61, 7  ;;  %v1236_v60 = vshrl.u32 %v4619_v29, 16 }
 0x140   :  { %v5635_v16 = vsel %vm5244_vm15, %v1299_v1, %v1303_v32  ;;  %v1239_v21 = vshll.u32 %v4619_v29, 16  ;;  %v1245_v2 = vshll.u32 %v1165_v35, 16  ;;  %v1250_v26 = vshrl.u32 %v4620_v19, 16  ;;  %v5002_v29 = vld [vmem:[%s6170_s3 + $0x20] sm:$0xff]  }
 0x141   :  { %v5642_v7 = vsel %vm5244_vm15, %v1313_v39, %v1317_v48  ;;  %v1326_v59 = vor.u32 %v1325_v14, %v1322_v58  ;;  %v1350_v44 = vcombine.low %v5255_v9, %v5635_v16  ;;  %v1238_v38 = vrot.slane %v1236_v60, 6  ;;  %v5649_v54 = vld.sshfl [vmem:[#allocation2 + $0x24] sm:$0x13 pattern:$0x76325410]  ;;  %4833 = vmatpush3.bf16.msra.mxu1 %v5002_v29  ;;  %v5006_v29 = vld [vmem:[%s6170_s3 + $0x28] sm:$0xff]  }
 0x142   :  { %v1241_v32 = vrot.slane %v1239_v21, 7  ;;  %v1247_v41 = vrot.slane %v1245_v2, 7  ;;  %v1252_v45 = vrot.slane %v1250_v26, 6  ;;  %v1253_v49 = vshll.u32 %v4620_v19, 16  ;;  %v5003_v58 = vld [vmem:[%s6170_s3 + $0x1c0] sm:$0xff]  }
 0x143   :  { %v5651_v56 = vld.sshfl [vmem:[#allocation2 + $0x28] sm:$0x13 pattern:$0x76325410]  ;;  %v1327_v48 = vrot.slane %v1326_v59, 2  ;;  %v1358_v34 = vrot.slane %v1350_v44, %v5239_v3  ;;  %v1259_v9 = vshll.u32 %v1173_v40, 16  ;;  %v1876_v39 = vcombine.high %v4654_v33, %v4654_v33  ;;  %4908 = vmatprep.subr.bf16.mxu0 %v5003_v58 }
 0x144   :  { %v1264_v52 = vshrl.u32 %v5616_v24, 16  ;;  %v1242_v53 = vor.u32 %v1241_v32, %v1238_v38  ;;  %v1255_v61 = vrot.slane %v1253_v49, 7  ;;  %v1267_v19 = vshll.u32 %v5616_v24, 16 }
 0x145   :  { %v1273_v63 = vshll.u32 %v1181_v13, 16  ;;  %v5661_v1 = vsel %vm5244_vm15, %v1327_v48, %v1331_v18  ;;  %v1261_v35 = vrot.slane %v1259_v9, 7  ;;  %v1884_v26 = vcombine.high %v4655_v47, %v4655_v47  ;;  %v5005_v18 = vld [vmem:[%s6170_s3 + $0x68] sm:$0xff]  }
 0x146   :  { %v1266_v5 = vrot.slane %v1264_v52, 6  ;;  %v1351_v40 = vcombine.low %v5642_v7, %v5661_v1  ;;  %v1243_v14 = vrot.slane %v1242_v53, 2  ;;  %v1256_v60 = vor.u32 %v1255_v61, %v1252_v45  ;;  %4834 = vmatprep.subr.bf16.mxu1 %v5005_v18  ;;  %v4640_v18 = vld.sshfl [vmem:[#allocation2 + $0x80] sm:$0x12 pattern:$0x76325410] }
 0x147   :  { %v1269_v21 = vrot.slane %v1267_v19, 7  ;;  %v1275_v2 = vrot.slane %v1273_v63, 7  ;;  %v1892_v24 = vcombine.high %v5649_v54, %v5649_v54  ;;  %v1900_v13 = vcombine.high %v5651_v56, %v5651_v56  ;;  %4835 = vmatpush3.bf16.msra.mxu1 %v5006_v29 }
 0x148   :  { %v1365_v27 = vrot.slane %v1351_v40, %v5239_v3  ;;  %v5675_v59 = vsel %vm5244_vm15, %v1243_v14, %v1247_v41  ;;  %v1257_v44 = vrot.slane %v1256_v60, 2  ;;  %v1958_v45 = vshrl.u32 %v4654_v33, 16 }
 0x149   :  { %v1270_v38 = vor.u32 %v1269_v21, %v1266_v5  ;;  %v1333_v32 = vcombine.low %v5259_v10, %v5675_v59  ;;  %v1961_v49 = vshll.u32 %v4654_v33, 16  ;;  %v1967_v48 = vshll.u32 %v1876_v39, 16  ;;  %v4639_v21 = vld.sshfl [vmem:[#allocation2 + $0x7c] sm:$0x12 pattern:$0x76325410] }
 0x14a   :  { %v1366_v9 = vcombine.low %v1358_v34, %v1365_v27  ;;  %v5684_v52 = vsel %vm5244_vm15, %v1257_v44, %v1261_v35  ;;  %v1972_v58 = vshrl.u32 %v4655_v47, 16  ;;  %v1960_v61 = vrot.slane %v1958_v45, 6  ;;  %v5011_v35 = vld [vmem:[%s6170_s3 + $0x70] sm:$0xff]  }
 0x14b   :  { %v1271_v41 = vrot.slane %v1270_v38, 2  ;;  %v1341_v53 = vrot.slane %v1333_v32, %v5239_v3  ;;  %v1963_v19 = vrot.slane %v1961_v49, 7  ;;  %v1969_v63 = vrot.slane %v1967_v48, 7  ;;  %4836 = vmatprep.subr.bf16.mxu1 %v5011_v35  ;;  %v5014_v49 = vld [vmem:[%s6170_s3 + $0x30] sm:$0xff]  }
 0x14c   :  { %1369 = vrot.lane.b32.xlu1 %v1366_v9, %s5074_s11  ;;  %v1974_v33 = vrot.slane %v1972_v58, 6  ;;  %v1975_v34 = vshll.u32 %v4655_v47, 16  ;;  %v1981_v5 = vshll.u32 %v1884_v26, 16  ;;  %v1986_v14 = vshrl.u32 %v5649_v54, 16  ;;  %4837 = vmatpush3.bf16.msra.mxu1 %v5014_v49 }
 0x14d   :  { %v5690_v10 = vsel %vm5244_vm15, %v1271_v41, %v1275_v2  ;;  %v1964_v40 = vor.u32 %v1963_v19, %v1960_v61  ;;  %v1989_v60 = vshll.u32 %v5649_v54, 16  ;;  %v1995_v44 = vshll.u32 %v1892_v24, 16  ;;  %v4641_v26 = vld.sshfl [vmem:[#allocation2 + $0x84] sm:$0x12 pattern:$0x76325410] }
 0x14e   :  { %v1334_v39 = vcombine.low %v5684_v52, %v5690_v10  ;;  %v1977_v27 = vrot.slane %v1975_v34, 7  ;;  %v1983_v2 = vrot.slane %v1981_v5, 7  ;;  %v2000_v47 = vshrl.u32 %v5651_v56, 16 }
 0x14f   :  { %v1965_v29 = vrot.slane %v1964_v40, 2  ;;  %v1988_v32 = vrot.slane %v1986_v14, 6  ;;  %v1991_v45 = vrot.slane %v1989_v60, 7  ;;  %v1997_v54 = vrot.slane %v1995_v44, 7 }
 0x150   :  { %v1348_v38 = vrot.slane %v1334_v39, %v5239_v3  ;;  %v1978_v48 = vor.u32 %v1977_v27, %v1974_v33  ;;  %v2002_v9 = vrot.slane %v2000_v47, 6  ;;  %v2003_v41 = vshll.u32 %v5651_v56, 16  ;;  %v4685_v34 = vld.sshfl [vmem:[#allocation2 + $0x70] sm:$0x13 pattern:$0x76325410] }
 0x151   :  { %v1970_v24 = vsel %vm5244_vm15, %v1965_v29, %v1969_v63  ;;  %v1992_v61 = vor.u32 %v1991_v45, %v1988_v32  ;;  %v2009_v19 = vshll.u32 %v1900_v13, 16  ;;  %v1669_v39 = vcombine.high %v4639_v21, %v4639_v21  ;;  %v5019_v56 = vld [vmem:[%s6170_s3 + $0x78] sm:$0xff]  }
 0x152   :  { %v1349_v58 = vcombine.low %v1341_v53, %v1348_v38  ;;  %v1979_v5 = vrot.slane %v1978_v48, 2  ;;  %v2005_v35 = vrot.slane %v2003_v41, 7  ;;  %v1677_v40 = vcombine.high %v4640_v18, %v4640_v18  ;;  %4838 = vmatprep.subr.bf16.mxu1 %v5019_v56  ;;  %v4672_v41 = vld.sshfl [vmem:[#allocation2 + $0x24] sm:$0x12 pattern:$0x76325410] }
 0x153   :  { %v1993_v14 = vrot.slane %v1992_v61, 2  ;;  %v2011_v33 = vrot.slane %v2009_v19, 7  ;;  %v1685_v60 = vcombine.high %v4641_v26, %v4641_v26  ;;  %v4647_v27 = vrot.slane %v4639_v21, 9  ;;  %v5020_v61 = vld [vmem:[%s6170_s3 + $0x38] sm:$0xff]  }
 0x154   :  { %1367 = vrot.lane.b32.xlu0 %v1349_v58, %s5074_s11  ;;  %v5713_v53 = vsel %vm5244_vm15, %v1979_v5, %v1983_v2  ;;  %v2006_v13 = vor.u32 %v2005_v35, %v2002_v9  ;;  %v1715_v63 = vrot.slane %v1669_v39, 7  ;;  %v4648_v44 = vrot.slane %v4640_v18, 9  ;;  %v4670_v21 = vld.sshfl [vmem:[#allocation2 + $0x1c] sm:$0x12 pattern:$0x76325410]  ;;  %4839 = vmatpush3.bf16.msra.mxu1 %v5020_v61 }
 0x155   :  { %v5717_v47 = vsel %vm5244_vm15, %v1993_v14, %v1997_v54  ;;  %v2030_v38 = vcombine.low %v1970_v24, %v5713_v53  ;;  %v1719_v29 = vrot.slane %v1677_v40, 7  ;;  %v4649_v32 = vrot.slane %v4641_v26, 9  ;;  %v4671_v9 = vld.sshfl [vmem:[#allocation2 + $0x20] sm:$0x12 pattern:$0x76325410] }
 0x156   :  { %v2007_v45 = vrot.slane %v2006_v13, 2  ;;  %v5722_v49 = vsel %vm5234_vm14, %v4647_v27, %v1715_v63  ;;  %v1723_v2 = vrot.slane %v1685_v60, 7  ;;  %v2540_v48 = vcombine.high %v4685_v34, %v4685_v34  ;;  %v4673_v24 = vld.sshfl [vmem:[#allocation2 + $0x28] sm:$0x12 pattern:$0x76325410] }
 0x157   :  { %v2038_v18 = vrot.slane %v2030_v38, %v5239_v3  ;;  %v5727_v54 = vsel %vm5234_vm14, %v4648_v44, %v1719_v29  ;;  %v1742_v26 = vcombine.low %v5266_v15, %v5722_v49  ;;  %v2616_v58 = vshrl.u32 %v4685_v34, 16 }
 0x158   :  { %v5736_v19 = vsel %vm5244_vm15, %v2007_v45, %v2011_v33  ;;  %v5740_v5 = vsel %vm5234_vm14, %v4649_v32, %v1723_v2  ;;  %v2619_v35 = vshll.u32 %v4685_v34, 16  ;;  %v2625_v39 = vshll.u32 %v2540_v48, 16 }
 0x159   :  { %v2031_v40 = vcombine.low %v5717_v47, %v5736_v19  ;;  %v1743_v15 = vcombine.low %v5727_v54, %v5740_v5  ;;  %v1750_v14 = vrot.slane %v1742_v26, %v5239_v3  ;;  %v2618_v60 = vrot.slane %v2616_v58, 6 }
 0x15a   :  { %v2621_v27 = vrot.slane %v2619_v35, 7  ;;  %v2627_v56 = vrot.slane %v2625_v39, 7  ;;  %v2685_v33 = vcombine.low %v5675_v59, %v5684_v52  ;;  %v2340_v13 = vcombine.high %v4670_v21, %v4670_v21  ;;  %v4701_v35 = vld.sshfl [vmem:[#allocation2 + $0x70] sm:$0x12 pattern:$0x76325410] }
 0x15b   :  { %v2045_v63 = vrot.slane %v2031_v40, %v5239_v3  ;;  %v1757_v34 = vrot.slane %v1743_v15, %v5239_v3  ;;  %v2348_v44 = vcombine.high %v4671_v9, %v4671_v9  ;;  %v2356_v38 = vcombine.high %v4672_v41, %v4672_v41 }
 0x15c   :  { %v2622_v29 = vor.u32 %v2621_v27, %v2618_v60  ;;  %v2693_v32 = vrot.slane %v2685_v33, %v5239_v3  ;;  %v2364_v45 = vcombine.high %v4673_v24, %v4673_v24  ;;  %v4678_v2 = vrot.slane %v4670_v21, 9  ;;  %v4689_v27 = vld.sshfl [vmem:[#allocation2 + $0x88] sm:$0x13 pattern:$0x76325410] }
 0x15d   :  { %v2046_v48 = vcombine.low %v2038_v18, %v2045_v63  ;;  %v1758_v26 = vcombine.low %v1750_v14, %v1757_v34  ;;  %v2383_v58 = vrot.slane %v2340_v13, 7  ;;  %v4679_v61 = vrot.slane %v4671_v9, 9 }
 0x15e   :  { %v2623_v39 = vrot.slane %v2622_v29, 2  ;;  %v2387_v17 = vrot.slane %v2348_v44, 7  ;;  %v4680_v59 = vrot.slane %v4672_v41, 9  ;;  %v2391_v52 = vrot.slane %v2356_v38, 7 }
 0x15f   :  { %2049 = vrot.lane.b32.xlu1 %v2046_v48, %s5074_s11  ;;  %1761 = vrot.lane.b32.xlu0 %v1758_v26, %s5074_s11  ;;  %v2384_v40 = vsel %vm5234_vm14, %v4678_v2, %v2383_v58  ;;  %v4681_v15 = vrot.slane %v4673_v24, 9  ;;  %v2395_v60 = vrot.slane %v2364_v45, 7  ;;  %v3359_v21 = vcombine.low %v5567_v11, %v5584_v42 }
 0x160   :  { %v2628_v9 = vsel %vm5244_vm15, %v2623_v39, %v2627_v56  ;;  %v5762_v18 = vsel %vm5234_vm14, %v4679_v61, %v2387_v17  ;;  %v5766_v41 = vsel %vm5234_vm14, %v4680_v59, %v2391_v52  ;;  %v3360_v14 = vcombine.low %v5595_v8, %v5285_v46  ;;  %v5025_v46 = vld [vmem:[%s6170_s3 + $0x140] sm:$0xff]   ;;  %v4705_v59 = vld.sshfl [vmem:[#allocation2 + $0x88] sm:$0x12 pattern:$0x76325410] }
 0x161   :  { %v2686_v24 = vcombine.low %v5690_v10, %v2628_v9  ;;  %v5773_v11 = vsel %vm5234_vm14, %v4681_v15, %v2395_v60  ;;  %v2414_v42 = vcombine.low %v2384_v40, %v5762_v18  ;;  %v3367_v56 = vrot.slane %v3359_v21, %v5239_v3  ;;  %4880 = vmatprep.subr.bf16.mxu1 %v5025_v46 }
 0x162   :  { %v2415_v17 = vcombine.low %v5766_v41, %v5773_v11  ;;  %v3374_v33 = vrot.slane %v3360_v14, %v5239_v3  ;;  %v3004_v13 = vcombine.high %v4701_v35, %v4701_v35  ;;  %v4709_v63 = vrot.slane %v4701_v35, 9 }
 0x163   :  { %v2700_v8 = vrot.slane %v2686_v24, %v5239_v3  ;;  %v2422_v10 = vrot.slane %v2414_v42, %v5239_v3  ;;  %v3069_v34 = vcombine.low %v5577_v55, %v5589_v6  ;;  %v2572_v44 = vcombine.high %v4689_v27, %v4689_v27 }
 0x164   :  { %v2429_v38 = vrot.slane %v2415_v17, %v5239_v3  ;;  %v3051_v29 = vrot.slane %v3004_v13, 7  ;;  %v2672_v45 = vshrl.u32 %v4689_v27, 16  ;;  %v3742_v2 = vsel %vm5234_vm14, %v4745_v36, %v5293_v51  ;;  %v4658_v13 = vld.sshfl [vmem:[#allocation2 + $0x34] sm:$0x13 pattern:$0x76325410] }
 0x165   :  { %v2701_v48 = vcombine.low %v2693_v32, %v2700_v8  ;;  %v3375_v26 = vcombine.low %v3367_v56, %v3374_v33  ;;  %v2675_v58 = vshll.u32 %v4689_v27, 16  ;;  %v2681_v61 = vshll.u32 %v2572_v44, 16  ;;  %v5839_v8 = vld.sshfl [vmem:[#allocation2 + $0x38] sm:$0x13 pattern:$0x76325410] }
 0x166   :  { %v2430_v35 = vcombine.low %v2422_v10, %v2429_v38  ;;  %v3052_v55 = vsel %vm5234_vm14, %v4709_v63, %v3051_v29  ;;  %v2674_v6 = vrot.slane %v2672_v45, 6  ;;  %v2702_v39 = vcombine.low %v5635_v16, %v5642_v7  ;;  %v5841_v10 = vld.sshfl [vmem:[#allocation2 + $0x3c] sm:$0x13 pattern:$0x76325410] }
 0x167   :  { %2719 = vrot.lane.b32.xlu1 %v2701_v48, %s5074_s11  ;;  %v3070_v12 = vcombine.low %v5599_v57, %v3052_v55  ;;  %v3077_v36 = vrot.slane %v3069_v34, %v5239_v3  ;;  %v2677_v51 = vrot.slane %v2675_v58, 7  ;;  %v3743_v32 = vcombine.low %v5518_v23, %v5535_v28 }
 0x168   :  { %2433 = vrot.lane.b32.xlu0 %v2430_v35, %s5074_s11  ;;  %v2683_v52 = vrot.slane %v2681_v61, 7  ;;  %v3744_v40 = vcombine.low %v5543_v20, %v5271_v22  ;;  %v3376_v16 = vcombine.low %v5713_v53, %v5717_v47  ;;  %v3377_v7 = vcombine.low %v5736_v19, %v5368_v0 }
 0x169   :  { %v3084_v57 = vrot.slane %v3070_v12, %v5239_v3  ;;  %v2678_v15 = vor.u32 %v2677_v51, %v2674_v6  ;;  %v3751_v60 = vrot.slane %v3743_v32, %v5239_v3  ;;  %v3036_v21 = vcombine.high %v4705_v59, %v4705_v59 }
 0x16a   :  { %v2710_v23 = vrot.slane %v2702_v39, %v5239_v3  ;;  %v3758_v28 = vrot.slane %v3744_v40, %v5239_v3  ;;  %v5814_v9 = vrot.slane %v3376_v16, %v5239_v3  ;;  %v4713_v22 = vrot.slane %v4705_v59, 9 }
 0x16b   :  { %3393 = vrot.lane.b32.xlu1 %v3375_v26, %s5074_s11  ;;  %v3085_v20 = vcombine.low %v3077_v36, %v3084_v57  ;;  %v2679_v53 = vrot.slane %v2678_v15, 2  ;;  %v3067_v47 = vrot.slane %v3036_v21, 7  ;;  %v3086_v0 = vcombine.low %v5722_v49, %v5727_v54  ;;  %v5055_v49 = vld [vmem:[%s6169_s2] ss:$0 sm:$0xff] }
 0x16c   :  { %v3759_v19 = vcombine.low %v3751_v60, %v3758_v28  ;;  %v3391_v14 = vrot.slane %v3377_v7, %v5239_v3  ;;  %v3760_v27 = vcombine.low %v5762_v18, %v5766_v41  ;;  %v3761_v24 = vcombine.low %v5773_v11, %v3742_v2 }
 0x16d   :  { %3103 = vrot.lane.b32.xlu0 %v3085_v20, %s5074_s11  ;;  %v2684_v42 = vsel %vm5244_vm15, %v2679_v53, %v2683_v52  ;;  %v3068_v56 = vsel %vm5234_vm14, %v4713_v22, %v3067_v47  ;;  %v3094_v17 = vrot.slane %v3086_v0, %v5239_v3  ;;  %v240_v54 = vadd.f32 %v5055_v49, %v5338_v30  ;;  %v5843_v30 = vld.sshfl [vmem:[#allocation2 + $0x40] sm:$0x13 pattern:$0x76325410] }
 0x16e   :  { %v2703_v18 = vcombine.low %v5661_v1, %v2684_v42  ;;  %v3087_v41 = vcombine.low %v5740_v5, %v3068_v56  ;;  %v3768_v11 = vrot.slane %v3760_v27, %v5239_v3  ;;  %v3775_v33 = vrot.slane %v3761_v24, %v5239_v3 }
 0x16f   :  { %vm260_vm3 = vcmp.gt.f32.partialorder %v240_v54, 0.0  ;;  %v276_v62 = vmul.f32 0.2, %v240_v54  ;;  %v232_v63 = vadd.f32 %v5055_v49, %v5347_v37  ;;  %v243_v46 = vadd.f32 %v5055_v49, %v5352_v43 }
 0x170   :  { %v2717_v1 = vrot.slane %v2703_v18, %v5239_v3  ;;  %v3392_v5 = vcombine.low %v5814_v9, %v3391_v14  ;;  %v3101_v34 = vrot.slane %v3087_v41, %v5239_v3  ;;  %v235_v44 = vadd.f32 %v5055_v49, %v5384_v50  ;;  %v1066_v49 = vld [vmem:[#allocation2 + $0xac] sm:$0x7] }
 0x171   :  { %3777 = vrot.lane.b32.xlu0 %v3759_v19, %s5074_s11  ;;  %v3776_v38 = vcombine.low %v3768_v11, %v3775_v33  ;;  %vm258_vm14 = vcmp.gt.f32.partialorder %v232_v63, 0.0  ;;  %v274_v37 = vmul.f32 0.2, %v232_v63  ;;  %vm261_vm4 = vcmp.gt.f32.partialorder %v243_v46, 0.0 }
 0x172   :  { %v2718_v43 = vcombine.low %v2710_v23, %v2717_v1  ;;  %v292_v29 = vsel %vm260_vm3, %v240_v54, %v276_v62  ;;  %v277_v45 = vmul.f32 0.2, %v243_v46  ;;  %vm259_vm5 = vcmp.gt.f32.partialorder %v235_v44, 0.0  ;;  %v1072_v62 = vld [vmem:[#allocation2 + $0xb4] sm:$0x7] }
 0x173   :  { %v3102_v2 = vcombine.low %v3094_v17, %v3101_v34  ;;  %v290_v48 = vsel %vm258_vm14, %v232_v63, %v274_v37  ;;  %v275_v26 = vmul.f32 0.2, %v235_v44  ;;  %v2078_v58 = vcombine.high %v4658_v13, %v4658_v13  ;;  %v1069_v1 = vld [vmem:[#allocation2 + $0xb0] sm:$0x7] }
 0x174   :  { %2721 = vrot.lane.b32.xlu1 %v2718_v43, %s5074_s11  ;;  %v293_v61 = vsel %vm261_vm4, %v243_v46, %v277_v45  ;;  %v2086_v50 = vcombine.high %v5839_v8, %v5839_v8  ;;  %v2094_v35 = vcombine.high %v5841_v10, %v5841_v10  ;;  %v2102_v55 = vcombine.high %v5843_v30, %v5843_v30  ;;  %v1054_v45 = vld [vmem:[#allocation2 + $0x94] sm:$0x7] }
 0x175   :  { %3105 = vrot.lane.b32.xlu0 %v3102_v2, %s5074_s11  ;;  %v301_v6 = vpack.c.bf16 %v293_v61, %v292_v29  ;;  %v4617_v39 = vpack.c.bf16 %v293_v61, %v293_v61  ;;  %v291_v59 = vsel %vm259_vm5, %v235_v44, %v275_v26  ;;  %v2136_v12 = vshrl.u32 %v4658_v13, 16 }
 0x176   :  { %v300_v36 = vpack.c.bf16 %v291_v59, %v290_v48  ;;  %v4616_v51 = vpack.c.bf16 %v291_v59, %v291_v59  ;;  %v2139_v32 = vshll.u32 %v4658_v13, 16  ;;  %v5859_v52 = vshll.u32 %v2078_v58, 16 }
 0x177   :  { %v923_v40 = vrot.slane %v301_v6, %v5239_v3  ;;  %v930_v16 = vrot.slane %v4617_v39, %v5239_v3  ;;  %v5863_v7 = vrot.slane %v2136_v12, 6  ;;  %v2150_v57 = vshrl.u32 %v5839_v8, 16 }
 0x178   :  { %3395 = vrot.lane.b32.xlu1 %v3392_v5, %s5074_s11  ;;  %v906_v15 = vrot.slane %v300_v36, %v5239_v3  ;;  %v913_v60 = vrot.slane %v4616_v51, %v5239_v3  ;;  %v5869_v21 = vrot.slane %v2139_v32, 7  ;;  %v2147_v23 = vrot.slane %v5859_v52, 7  ;;  %v1075_v5 = vld [vmem:[#allocation2 + $0xb8] sm:$0x7] }
 0x179   :  { %3779 = vrot.lane.b32.xlu0 %v3776_v38, %s5074_s11  ;;  %v931_v28 = vcombine.high %v923_v40, %v923_v40  ;;  %v932_v9 = vcombine.high %v930_v16, %v930_v16  ;;  %v967_v22 = vrot.slane %v923_v40, %v5239_v3  ;;  %v981_v20 = vrot.slane %v930_v16, %v5239_v3  ;;  %v1057_v40 = vld [vmem:[#allocation2 + $0x98] sm:$0x7]  ;;  %v1060_v16 = vld [vmem:[#allocation2 + $0x9c] sm:$0x7] }
 0x17a   :  { %v914_v53 = vcombine.high %v906_v15, %v906_v15  ;;  %v915_v47 = vcombine.high %v913_v60, %v913_v60  ;;  %v939_v0 = vrot.slane %v906_v15, %v5239_v3  ;;  %v953_v19 = vrot.slane %v913_v60, %v5239_v3 }
 0x17b   :  { %v974_v14 = vrot.slane %v931_v28, %v5239_v3  ;;  %v988_v27 = vrot.slane %v932_v9, %v5239_v3  ;;  %v1018_v24 = vshrl.u32 %v967_v22, 16  ;;  %v1021_v42 = vshll.u32 %v967_v22, 16 }
 0x17c   :  { %v1032_v56 = vshrl.u32 %v981_v20, 16  ;;  %v1035_v17 = vshll.u32 %v981_v20, 16  ;;  %v946_v54 = vrot.slane %v914_v53, %v5239_v3  ;;  %v960_v18 = vrot.slane %v915_v47, %v5239_v3  ;;  %v1063_v47 = vld [vmem:[#allocation2 + $0xa0] sm:$0x7] }
 0x17d   :  { %v1020_v41 = vrot.slane %v1018_v24, 7  ;;  %v1025_v11 = vshrl.u32 %v974_v14, 16  ;;  %v1028_v33 = vshll.u32 %v974_v14, 16  ;;  %v1039_v13 = vshrl.u32 %v988_v27, 16 }
 0x17e   :  { %v1034_v63 = vrot.slane %v1032_v56, 7  ;;  %v1042_v46 = vshll.u32 %v988_v27, 16  ;;  %v990_v34 = vshrl.u32 %v939_v0, 16  ;;  %v993_v44 = vshll.u32 %v939_v0, 16 }
 0x17f   :  { %v1023_v38 = vor.u32 %v1021_v42, %v1020_v41  ;;  %v1027_v37 = vrot.slane %v1025_v11, 7  ;;  %v1041_v43 = vrot.slane %v1039_v13, 7  ;;  %v997_v29 = vshrl.u32 %v946_v54, 16 }
 0x180   :  { %v1037_v2 = vor.u32 %v1035_v17, %v1034_v63  ;;  %v992_v48 = vrot.slane %v990_v34, 7  ;;  %v1000_v26 = vshll.u32 %v946_v54, 16  ;;  %v1004_v58 = vshrl.u32 %v953_v19, 16 }
 0x181   :  { %v1030_v61 = vor.u32 %v1028_v33, %v1027_v37  ;;  %v1044_v6 = vor.u32 %v1042_v46, %v1041_v43  ;;  %v1067_v39 = vsel %vm5316_vm8, %v1023_v38, %v1066_v49  ;;  %v999_v59 = vrot.slane %v997_v29, 7  ;;  %v5057_v56 = vld.sshfl [vmem:[#allocation2 + $0x3c] sm:$0xf pattern:$0x76325410] }
 0x182   :  { %1068 = vst [vmem:[#allocation2 + $0xac] sm:$0x7] %v1067_v39  ;;  %v1073_v12 = vsel %vm5316_vm8, %v1037_v2, %v1072_v62  ;;  %v995_v36 = vor.u32 %v993_v44, %v992_v48  ;;  %v1006_v51 = vrot.slane %v1004_v58, 7  ;;  %v1007_v32 = vshll.u32 %v953_v19, 16 }
 0x183   :  { %v1070_v15 = vsel %vm5316_vm8, %v1030_v61, %v1069_v1  ;;  %1074 = vst [vmem:[#allocation2 + $0xb4] sm:$0x7] %v1073_v12  ;;  %v1076_v60 = vsel %vm5316_vm8, %v1044_v6, %v1075_v5  ;;  %v1002_v28 = vor.u32 %v1000_v26, %v999_v59  ;;  %v1011_v9 = vshrl.u32 %v960_v18, 16 }
 0x184   :  { %1071 = vst [vmem:[#allocation2 + $0xb0] sm:$0x7] %v1070_v15  ;;  %1077 = vst [vmem:[#allocation2 + $0xb8] sm:$0x7] %v1076_v60  ;;  %v1009_v22 = vor.u32 %v1007_v32, %v1006_v51  ;;  %v1014_v20 = vshll.u32 %v960_v18, 16  ;;  %v1055_v53 = vsel %vm5316_vm8, %v995_v36, %v1054_v45  ;;  %v2142_v0 = vor.u32 %v5869_v21, %v5863_v7 }
 0x185   :  { %v5056_v19 = vld.sshfl [vmem:[#allocation2 + $0x34] sm:$0xf pattern:$0x76325410]  ;;  %v1013_v14 = vrot.slane %v1011_v9, 7  ;;  %v1058_v27 = vsel %vm5316_vm8, %v1002_v28, %v1057_v40  ;;  %v2152_v24 = vrot.slane %v2150_v57, 6 }
 0x186   :  { %1056 = vst [vmem:[#allocation2 + $0x94] sm:$0x7] %v1055_v53  ;;  %v2153_v42 = vshll.u32 %v5839_v8, 16  ;;  %1059 = vst [vmem:[#allocation2 + $0x98] sm:$0x7] %v1058_v27  ;;  %v1061_v17 = vsel %vm5316_vm8, %v1009_v22, %v1060_v16  ;;  %v2143_v49 = vrot.slane %v2142_v0, 2  ;;  %v1799_v2 = vcombine.low %v5056_v19, %v5057_v56 }
 0x187   :  { %v2159_v7 = vshll.u32 %v2086_v50, 16  ;;  %v2164_v21 = vshrl.u32 %v5841_v10, 16  ;;  %v5904_v54 = vld.sshfl [vmem:[#allocation2 + $0x4c] sm:$0xf pattern:$0x76325410]  ;;  %v1016_v18 = vor.u32 %v1014_v20, %v1013_v14 }
 0x188   :  { %1062 = vst [vmem:[#allocation2 + $0x9c] sm:$0x7] %v1061_v17  ;;  %v2155_v41 = vrot.slane %v2153_v42, 7  ;;  %v2167_v57 = vshll.u32 %v5841_v10, 16  ;;  %v2173_v11 = vshll.u32 %v2094_v35, 16  ;;  %v2148_v33 = vsel %vm5244_vm15, %v2143_v49, %v2147_v23  ;;  %1819 = vst.msk [vmem:[#allocation3 + $0x10] sm:$0xff] %vm124_vm0, %v1799_v2 }
 0x189   :  { %v2161_v8 = vrot.slane %v2159_v7, 7  ;;  %v2166_v50 = vrot.slane %v2164_v21, 6  ;;  %v2178_v13 = vshrl.u32 %v5843_v30, 16  ;;  %v1064_v63 = vsel %vm5316_vm8, %v1016_v18, %v1063_v47 }
 0x18a   :  { %v4626_v62 = vld.sshfl [vmem:[#allocation2 + $0x90] sm:$0x13 pattern:$0x76325410]  ;;  %v2156_v46 = vor.u32 %v2155_v41, %v2152_v24  ;;  %v2169_v1 = vrot.slane %v2167_v57, 7  ;;  %v2175_v5 = vrot.slane %v2173_v11, 7 }
 0x18b   :  { %v5917_v34 = vld.sshfl [vmem:[#allocation2 + $0xa8] sm:$0xf pattern:$0x76325410]  ;;  %1065 = vst [vmem:[#allocation2 + $0xa0] sm:$0x7] %v1064_v63  ;;  %v1399_v38 = vcombine.high %v4626_v62, %v4626_v62 }
 0x18c   :  { %v2180_v10 = vrot.slane %v2178_v13, 6  ;;  %v2181_v35 = vshll.u32 %v5843_v30, 16  ;;  %v2187_v52 = vshll.u32 %v2102_v55, 16  ;;  %v2157_v23 = vrot.slane %v2156_v46, 2 }
 0x18d   :  { %v2170_v44 = vor.u32 %v2169_v1, %v2166_v50  ;;  %v4627_v31 = vld.sshfl [vmem:[#allocation2 + $0x94] sm:$0x13 pattern:$0x76325410]  ;;  %v1457_v55 = vshrl.u32 %v4626_v62, 16  ;;  %v1460_v12 = vshll.u32 %v4626_v62, 16 }
 0x18e   :  { %v2183_v37 = vrot.slane %v2181_v35, 7  ;;  %v2189_v43 = vrot.slane %v2187_v52, 7  ;;  %v5925_v29 = vsel %vm5244_vm15, %v2157_v23, %v2161_v8  ;;  %v4628_v48 = vld.sshfl [vmem:[#allocation2 + $0x98] sm:$0x13 pattern:$0x76325410]  ;;  %v1407_v26 = vcombine.high %v4627_v31, %v4627_v31 }
 0x18f   :  { %v2171_v45 = vrot.slane %v2170_v44, 2  ;;  %v2247_v61 = vcombine.low %v2148_v33, %v5925_v29  ;;  %v4629_v6 = vld.sshfl [vmem:[#allocation2 + $0x9c] sm:$0x13 pattern:$0x76325410]  ;;  %v1415_v30 = vcombine.high %v4628_v48, %v4628_v48  ;;  %v1466_v36 = vshll.u32 %v1399_v38, 16 }
 0x190   :  { %v2184_v58 = vor.u32 %v2183_v37, %v2180_v10  ;;  %v1423_v59 = vcombine.high %v4629_v6, %v4629_v6  ;;  %v1459_v40 = vrot.slane %v1457_v55, 6  ;;  %v1471_v16 = vshrl.u32 %v4627_v31, 16  ;;  %v5060_v24 = vld.sshfl [vmem:[#allocation2 + $0xb0] sm:$0xf pattern:$0x76325410] }
 0x191   :  { %v5930_v39 = vsel %vm5244_vm15, %v2171_v45, %v2175_v5  ;;  %v2255_v32 = vrot.slane %v2247_v61, %v5239_v3  ;;  %v1462_v15 = vrot.slane %v1460_v12, 7  ;;  %v1468_v60 = vrot.slane %v1466_v36, 7  ;;  %v5061_v42 = vld.sshfl [vmem:[#allocation2 + $0x90] sm:$0xf pattern:$0x76325410] }
 0x192   :  { %v2185_v51 = vrot.slane %v2184_v58, 2  ;;  %v1474_v28 = vshll.u32 %v4627_v31, 16  ;;  %v1480_v9 = vshll.u32 %v1407_v26, 16  ;;  %v1473_v20 = vrot.slane %v1471_v16, 6 }
 0x193   :  { %v1485_v53 = vshrl.u32 %v4628_v48, 16  ;;  %v1488_v47 = vshll.u32 %v4628_v48, 16  ;;  %v1463_v19 = vor.u32 %v1462_v15, %v1459_v40  ;;  %v1494_v49 = vshll.u32 %v1415_v30, 16 }
 0x194   :  { %v5936_v22 = vsel %vm5244_vm15, %v2185_v51, %v2189_v43  ;;  %v1476_v14 = vrot.slane %v1474_v28, 7  ;;  %v1482_v27 = vrot.slane %v1480_v9, 7  ;;  %v1499_v7 = vshrl.u32 %v4629_v6, 16 }
 0x195   :  { %v2248_v0 = vcombine.low %v5930_v39, %v5936_v22  ;;  %v1487_v56 = vrot.slane %v1485_v53, 6  ;;  %v1490_v17 = vrot.slane %v1488_v47, 7  ;;  %v1464_v18 = vrot.slane %v1463_v19, 2 }
 0x196   :  { %v1477_v41 = vor.u32 %v1476_v14, %v1473_v20  ;;  %v1502_v57 = vshll.u32 %v4629_v6, 16  ;;  %v5062_v11 = vld.sshfl [vmem:[#allocation2 + $0x98] sm:$0xf pattern:$0x76325410]  ;;  %v1496_v50 = vrot.slane %v1494_v49, 7  ;;  %v1128_v45 = vcombine.low %v5917_v34, %v5060_v24 }
 0x197   :  { %v2262_v21 = vrot.slane %v2248_v0, %v5239_v3  ;;  %v5063_v33 = vld.sshfl [vmem:[#allocation2 + $0x54] sm:$0xf pattern:$0x76325410]  ;;  %v1491_v8 = vor.u32 %v1490_v17, %v1487_v56  ;;  %v1501_v13 = vrot.slane %v1499_v7, 6  ;;  %v1508_v62 = vshll.u32 %v1423_v59, 16 }
 0x198   :  { %v1469_v46 = vsel %vm5244_vm15, %v1464_v18, %v1468_v60  ;;  %v1478_v1 = vrot.slane %v1477_v41, 2  ;;  %v1504_v5 = vrot.slane %v1502_v57, 7  ;;  %v4630_v10 = vld.sshfl [vmem:[#allocation2 + $0xa8] sm:$0x13 pattern:$0x76325410]  ;;  %v1111_v58 = vcombine.low %v5061_v42, %v5062_v11 }
 0x199   :  { %v2263_v63 = vcombine.low %v2255_v32, %v2262_v21  ;;  %v1492_v35 = vrot.slane %v1491_v8, 2  ;;  %v1510_v52 = vrot.slane %v1508_v62, 7  ;;  %v4631_v23 = vld.sshfl [vmem:[#allocation2 + $0xac] sm:$0x13 pattern:$0x76325410]  ;;  %v1431_v48 = vcombine.high %v4630_v10, %v4630_v10 }
 0x19a   :  { %v5946_v44 = vsel %vm5244_vm15, %v1478_v1, %v1482_v27  ;;  %v1505_v38 = vor.u32 %v1504_v5, %v1501_v13  ;;  %v4632_v37 = vld.sshfl [vmem:[#allocation2 + $0xb0] sm:$0x13 pattern:$0x76325410]  ;;  %v1816_v61 = vcombine.low %v5904_v54, %v5063_v33  ;;  %v1439_v6 = vcombine.high %v4631_v23, %v4631_v23  ;;  %1132 = vst.msk [vmem:[#allocation3 + $0x40] sm:$0xff] %vm124_vm0, %v1128_v45 }
 0x19b   :  { %2283 = vst.msk [vmem:[#allocation3 + $0x18] sm:$0xff] %vm124_vm0, %v2263_v63  ;;  %v5950_v43 = vsel %vm5244_vm15, %v1492_v35, %v1496_v50  ;;  %v1568_v31 = vcombine.low %v1469_v46, %v5946_v44  ;;  %v4633_v2 = vld.sshfl [vmem:[#allocation2 + $0xb4] sm:$0x13 pattern:$0x76325410]  ;;  %v1447_v55 = vcombine.high %v4632_v37, %v4632_v37  ;;  %v1513_v12 = vshrl.u32 %v4630_v10, 16 }
 0x19c   :  { %v1506_v26 = vrot.slane %v1505_v38, 2  ;;  %v1455_v59 = vcombine.high %v4633_v2, %v4633_v2  ;;  %1131 = vst.msk [vmem:[#allocation3] sm:$0xff] %vm124_vm0, %v1111_v58  ;;  %1820 = vst.msk [vmem:[#allocation3 + $0x50] sm:$0xff] %vm124_vm0, %v1816_v61  ;;  %v1516_v34 = vshll.u32 %v4630_v10, 16  ;;  %v1522_v51 = vshll.u32 %v1431_v48, 16 }
 0x19d   :  { %v1576_v30 = vrot.slane %v1568_v31, %v5239_v3  ;;  %v1527_v32 = vshrl.u32 %v4631_v23, 16  ;;  %v1515_v40 = vrot.slane %v1513_v12, 6  ;;  %v1530_v16 = vshll.u32 %v4631_v23, 16 }
 0x19e   :  { %v5959_v36 = vsel %vm5244_vm15, %v1506_v26, %v1510_v52  ;;  %v1536_v15 = vshll.u32 %v1439_v6, 16  ;;  %v5064_v60 = vld.sshfl [vmem:[#allocation2 + $0x94] sm:$0xf pattern:$0x76325410]  ;;  %v1518_v28 = vrot.slane %v1516_v34, 7 }
 0x19f   :  { %v1569_v54 = vcombine.low %v5950_v43, %v5959_v36  ;;  %v1524_v9 = vrot.slane %v1522_v51, 7  ;;  %v1529_v20 = vrot.slane %v1527_v32, 6  ;;  %v1541_v53 = vshrl.u32 %v4632_v37, 16 }
 0x1a0   :  { %v5065_v47 = vld.sshfl [vmem:[#allocation2 + $0x9c] sm:$0xf pattern:$0x76325410]  ;;  %v1532_v19 = vrot.slane %v1530_v16, 7  ;;  %v1538_v14 = vrot.slane %v1536_v15, 7  ;;  %v1519_v42 = vor.u32 %v1518_v28, %v1515_v40 }
 0x1a1   :  { %v1583_v0 = vrot.slane %v1569_v54, %v5239_v3  ;;  %v1544_v27 = vshll.u32 %v4632_v37, 16  ;;  %v4662_v24 = vld.sshfl [vmem:[#allocation2 + $0x4c] sm:$0x13 pattern:$0x76325410]  ;;  %v1543_v56 = vrot.slane %v1541_v53, 6  ;;  %v2471_v45 = vcombine.low %v5064_v60, %v5065_v47 }
 0x1a2   :  { %v1550_v17 = vshll.u32 %v1447_v55, 16  ;;  %v1555_v49 = vshrl.u32 %v4633_v2, 16  ;;  %v2432_v7 = vpop.permute.xlu1 %2431  ;;  %v1533_v18 = vor.u32 %v1532_v19, %v1529_v20  ;;  %v1558_v57 = vshll.u32 %v4633_v2, 16 }
 0x1a3   :  { %v1584_v21 = vcombine.low %v1576_v30, %v1583_v0  ;;  %v1546_v41 = vrot.slane %v1544_v27, 7  ;;  %v4663_v11 = vld.sshfl [vmem:[#allocation2 + $0x50] sm:$0x13 pattern:$0x76325410]  ;;  %2437 = vst.msk [vmem:[#allocation3 + $0x18] sm:$0xff] %vm1373_vm6, %v2432_v7  ;;  %v2110_v10 = vcombine.high %v4662_v24, %v4662_v24 }
 0x1a4   :  { %v1520_v33 = vrot.slane %v1519_v42, 2  ;;  %v1552_v8 = vrot.slane %v1550_v17, 7  ;;  %v1557_v50 = vrot.slane %v1555_v49, 6  ;;  %v1564_v13 = vshll.u32 %v1455_v59, 16  ;;  %2491 = vst.msk [vmem:[#allocation3 + $0x20] sm:$0xff] %vm124_vm0, %v2471_v45 }
 0x1a5   :  { %1604 = vst.msk [vmem:[#allocation3 + $0x8] sm:$0xff] %vm124_vm0, %v1584_v21  ;;  %v1534_v62 = vrot.slane %v1533_v18, 2  ;;  %v1547_v63 = vor.u32 %v1546_v41, %v1543_v56  ;;  %v1560_v46 = vrot.slane %v1558_v57, 7  ;;  %v2118_v2 = vcombine.high %v4663_v11, %v4663_v11 }
 0x1a6   :  { %v4664_v1 = vld.sshfl [vmem:[#allocation2 + $0x54] sm:$0x13 pattern:$0x76325410]  ;;  %v1525_v5 = vsel %vm5244_vm15, %v1520_v33, %v1524_v9  ;;  %v1566_v38 = vrot.slane %v1564_v13, 7  ;;  %v2192_v61 = vshrl.u32 %v4662_v24, 16 }
 0x1a7   :  { %v5972_v35 = vsel %vm5244_vm15, %v1534_v62, %v1538_v14  ;;  %v1548_v52 = vrot.slane %v1547_v63, 2  ;;  %v1561_v23 = vor.u32 %v1560_v46, %v1557_v50  ;;  %v4665_v37 = vld.sshfl [vmem:[#allocation2 + $0x58] sm:$0x13 pattern:$0x76325410]  ;;  %v2126_v48 = vcombine.high %v4664_v1, %v4664_v1 }
 0x1a8   :  { %v1585_v31 = vcombine.low %v1525_v5, %v5972_v35  ;;  %v2195_v6 = vshll.u32 %v4662_v24, 16  ;;  %v2134_v30 = vcombine.high %v4665_v37, %v4665_v37  ;;  %v2201_v55 = vshll.u32 %v2110_v10, 16  ;;  %v5066_v24 = vld.sshfl [vmem:[#allocation2 + $0x38] sm:$0xf pattern:$0x76325410] }
 0x1a9   :  { %v5977_v26 = vsel %vm5244_vm15, %v1548_v52, %v1552_v8  ;;  %v1562_v58 = vrot.slane %v1561_v23, 2  ;;  %v2206_v59 = vshrl.u32 %v4663_v11, 16  ;;  %v2209_v12 = vshll.u32 %v4663_v11, 16 }
 0x1aa   :  { %v3788_v34 = vld [vmem:[#allocation3 + $0x18] sm:$0xff]  ;;  %v1593_v32 = vrot.slane %v1585_v31, %v5239_v3  ;;  %v2194_v54 = vrot.slane %v2192_v61, 6  ;;  %v2197_v40 = vrot.slane %v2195_v6, 7  ;;  %v2215_v28 = vshll.u32 %v2118_v2, 16 }
 0x1ab   :  { %v5982_v51 = vsel %vm5244_vm15, %v1562_v58, %v1566_v38  ;;  %4401 = vmatprep.mubr.bf16.mxu0 %v3788_v34  ;;  %v2208_v15 = vrot.slane %v2206_v59, 6  ;;  %v2211_v60 = vrot.slane %v2209_v12, 7  ;;  %v2203_v20 = vrot.slane %v2201_v55, 7 }
 0x1ac   :  { %v1586_v16 = vcombine.low %v5977_v26, %v5982_v51  ;;  %v2198_v9 = vor.u32 %v2197_v40, %v2194_v54  ;;  %v2220_v53 = vshrl.u32 %v4664_v1, 16  ;;  %v2223_v47 = vshll.u32 %v4664_v1, 16  ;;  %v5067_v42 = vld.sshfl [vmem:[#allocation2 + $0x40] sm:$0xf pattern:$0x76325410] }
 0x1ad   :  { %v2212_v19 = vor.u32 %v2211_v60, %v2208_v15  ;;  %v2229_v14 = vshll.u32 %v2126_v48, 16  ;;  %v2234_v27 = vshrl.u32 %v4665_v37, 16  ;;  %v2237_v7 = vshll.u32 %v4665_v37, 16  ;;  %v5004_v54 = vld [vmem:[%s6170_s3 + $0x180] sm:$0xff]   ;;  %v5007_v40 = vld [vmem:[%s6170_s3 + $0x1c8] sm:$0xff]  }
 0x1ae   :  { %v1600_v0 = vrot.slane %v1586_v16, %v5239_v3  ;;  %v2199_v56 = vrot.slane %v2198_v9, 2  ;;  %v2222_v17 = vrot.slane %v2220_v53, 6  ;;  %v2225_v49 = vrot.slane %v2223_v47, 7 }
 0x1af   :  { %v2213_v18 = vrot.slane %v2212_v19, 2  ;;  %v2217_v41 = vrot.slane %v2215_v28, 7  ;;  %v2236_v57 = vrot.slane %v2234_v27, 6  ;;  %v2239_v13 = vrot.slane %v2237_v7, 7 }
 0x1b0   :  { %v1601_v21 = vcombine.low %v1593_v32, %v1600_v0  ;;  %v2048_v11 = vpop.permute.xlu1 %2047  ;;  %v2204_v8 = vsel %vm5244_vm15, %v2199_v56, %v2203_v20  ;;  %v2226_v50 = vor.u32 %v2225_v49, %v2222_v17  ;;  %v2243_v62 = vshll.u32 %v2134_v30, 16  ;;  %v4693_v63 = vld.sshfl [vmem:[#allocation2 + $0xa0] sm:$0x13 pattern:$0x76325410]  ;;  %v5008_v49 = vld [vmem:[%s6170_s3 + $0x188] sm:$0xff]  }
 0x1b1   :  { %v1760_v33 = vpop.permute.xlu0 %1759  ;;  %2053 = vst.msk [vmem:[#allocation3 + $0x10] sm:$0xff] %vm1373_vm6, %v2048_v11  ;;  %v5995_v46 = vsel %vm5244_vm15, %v2213_v18, %v2217_v41  ;;  %v2774_v1 = vcombine.high %v4693_v63, %v4693_v63  ;;  %v5068_v5 = vld.sshfl [vmem:[#allocation2 + $0xac] sm:$0xf pattern:$0x76325410]  ;;  %v2231_v52 = vrot.slane %v2229_v14, 7  ;;  %v2240_v23 = vor.u32 %v2239_v13, %v2236_v57 }
 0x1b2   :  { %1765 = vst.msk [vmem:[#allocation3 + $0x8] sm:$0xff] %vm1373_vm6, %v1760_v33  ;;  %v2227_v10 = vrot.slane %v2226_v50, 2  ;;  %v2264_v38 = vcombine.low %v2204_v8, %v5995_v46  ;;  %v5069_v37 = vld.sshfl [vmem:[#allocation2 + $0xb4] sm:$0xf pattern:$0x76325410]  ;;  %v3144_v45 = vcombine.low %v5066_v24, %v5067_v42  ;;  %v2919_v55 = vcombine.low %v5946_v44, %v5950_v43 }
 0x1b3   :  { %1605 = vst.msk [vmem:[#allocation3 + $0x48] sm:$0xff] %vm124_vm0, %v1601_v21  ;;  %v4725_v31 = vld.sshfl [vmem:[#allocation2 + $0x44] sm:$0x13 pattern:$0x76325410]  ;;  %v2850_v2 = vshrl.u32 %v4693_v63, 16  ;;  %v2488_v14 = vcombine.low %v5068_v5, %v5069_v37  ;;  %v3593_v21 = vcombine.low %v5925_v29, %v5930_v39 }
 0x1b4   :  { %v2853_v48 = vshll.u32 %v4693_v63, 16  ;;  %v2859_v58 = vshll.u32 %v2774_v1, 16  ;;  %v6000_v61 = vsel %vm5244_vm15, %v2227_v10, %v2231_v52  ;;  %v2241_v6 = vrot.slane %v2240_v23, 2  ;;  %3164 = vst.msk [vmem:[#allocation3 + $0x30] sm:$0xff] %vm124_vm0, %v3144_v45  ;;  %v5015_v41 = vld [vmem:[%s6170_s3 + $0x1d0] sm:$0xff]  }
 0x1b5   :  { %v2245_v30 = vrot.slane %v2243_v62, 7  ;;  %v5070_v59 = vld.sshfl [vmem:[#allocation2 + $0x50] sm:$0xf pattern:$0x76325410]  ;;  %v2272_v12 = vrot.slane %v2264_v38, %v5239_v3  ;;  %v2852_v34 = vrot.slane %v2850_v2, 6  ;;  %v3448_v43 = vcombine.high %v4725_v31, %v4725_v31 }
 0x1b6   :  { %v2855_v32 = vrot.slane %v2853_v48, 7  ;;  %v2861_v44 = vrot.slane %v2859_v58, 7  ;;  %v5071_v15 = vld.sshfl [vmem:[#allocation2 + $0x58] sm:$0xf pattern:$0x76325410]  ;;  %v2927_v19 = vrot.slane %v2919_v55, %v5239_v3  ;;  %v3601_v38 = vrot.slane %v3593_v21, %v5239_v3 }
 0x1b7   :  { %v6014_v16 = vsel %vm5244_vm15, %v2241_v6, %v2245_v30  ;;  %v3524_v9 = vshrl.u32 %v4725_v31, 16  ;;  %v3527_v20 = vshll.u32 %v4725_v31, 16  ;;  %v4697_v53 = vld.sshfl [vmem:[#allocation2 + $0xb8] sm:$0x13 pattern:$0x76325410]  ;;  %v3161_v62 = vcombine.low %v5070_v59, %v5071_v15 }
 0x1b8   :  { %v2265_v60 = vcombine.low %v6000_v61, %v6014_v16  ;;  %v2856_v28 = vor.u32 %v2855_v32, %v2852_v34  ;;  %v3787_v47 = vld [vmem:[#allocation3 + $0x10] sm:$0xff]  ;;  %v3533_v27 = vshll.u32 %v3448_v43, 16  ;;  %2492 = vst.msk [vmem:[#allocation3 + $0x60] sm:$0xff] %vm124_vm0, %v2488_v14  ;;  %v2806_v18 = vcombine.high %v4697_v53, %v4697_v53  ;;  %v5021_v31 = vld [vmem:[%s6170_s3 + $0x1d8] sm:$0xff]   ;;  %v5034_v14 = vld [vmem:[%s6170_s3 + $0x1a8] sm:$0xff]  }
 0x1b9   :  { %v3786_v0 = vld [vmem:[#allocation3 + $0x8] sm:$0xff]  ;;  %4402 = vmatmul.mubr.bf16.vlgmr.msra.gmra.mrb[16].mxu0 %v3787_v47  ;;  %v3526_v56 = vrot.slane %v3524_v9, 6  ;;  %v3529_v17 = vrot.slane %v3527_v20, 7  ;;  %v2906_v8 = vshrl.u32 %v4697_v53, 16  ;;  %v2909_v63 = vshll.u32 %v4697_v53, 16  ;;  %v5016_v52 = vld [vmem:[%s6170_s3 + $0x190] sm:$0xff]  }
 0x1ba   :  { %4352 = vmatprep.mubr.bf16.mxu1 %v3786_v0  ;;  %v2279_v24 = vrot.slane %v2265_v60, %v5239_v3  ;;  %v2857_v42 = vrot.slane %v2856_v28, 2  ;;  %4909 = vmatpush3.bf16.msra.mxu0 %v5004_v54  ;;  %v3535_v7 = vrot.slane %v3533_v27, 7  ;;  %v4729_v50 = vld.sshfl [vmem:[#allocation2 + $0x5c] sm:$0x13 pattern:$0x76325410] }
 0x1bb   :  { %4910 = vmatprep.subr.bf16.mxu0 %v5007_v40  ;;  %v3530_v33 = vor.u32 %v3529_v17, %v3526_v56  ;;  %v2915_v1 = vshll.u32 %v2806_v18, 16  ;;  %v2908_v39 = vrot.slane %v2906_v8, 6  ;;  %v3480_v5 = vcombine.high %v4729_v50, %v4729_v50  ;;  %3165 = vst.msk [vmem:[#allocation3 + $0x70] sm:$0xff] %vm124_vm0, %v3161_v62  ;;  %v5022_v32 = vld [vmem:[%s6170_s3 + $0x198] sm:$0xff]   ;;  %v5028_v53 = vld [vmem:[%s6170_s3 + $0x1a0] sm:$0xff]   ;;  %v5032_v17 = vld [vmem:[%s6170_s3 + $0x108] sm:$0xff]  }
 0x1bc   :  { %v2280_v57 = vcombine.low %v2272_v12, %v2279_v24  ;;  %v2862_v11 = vsel %vm5244_vm15, %v2857_v42, %v2861_v44  ;;  %v3580_v37 = vshrl.u32 %v4729_v50, 16  ;;  %v3583_v48 = vshll.u32 %v4729_v50, 16  ;;  %v5026_v24 = vld [vmem:[%s6170_s3 + $0x100] sm:$0xff]  }
 0x1bd   :  { %v2920_v13 = vcombine.low %v5959_v36, %v2862_v11  ;;  %v3531_v29 = vrot.slane %v3530_v33, 2  ;;  %v2911_v36 = vrot.slane %v2909_v63, 7  ;;  %v2917_v2 = vrot.slane %v2915_v1, 7  ;;  %v5043_v11 = vld [vmem:[%s6170_s3 + $0x158] sm:$0xff]   ;;  %v5048_v1 = vld [vmem:[%s6170_s3 + $0x120] sm:$0xff]  }
 0x1be   :  { %2284 = vst.msk [vmem:[#allocation3 + $0x58] sm:$0xff] %vm124_vm0, %v2280_v57  ;;  %4911 = vmatpush3.bf16.msra.mxu0 %v5008_v49  ;;  %v1370_v10 = vpop.permute.xlu1 %1369  ;;  %v3589_v58 = vshll.u32 %v3480_v5, 16  ;;  %v3582_v59 = vrot.slane %v3580_v37, 6  ;;  %v2936_v12 = vcombine.low %v5972_v35, %v5977_v26  ;;  %v3585_v34 = vrot.slane %v3583_v48, 7  ;;  %v5045_v49 = vld [vmem:[%s6170_s3 + $0x1f8] sm:$0xff]   ;;  %v5038_v57 = vld [vmem:[%s6170_s3 + $0x110] sm:$0xff]  }
 0x1bf   :  { %v2934_v23 = vrot.slane %v2920_v13, %v5239_v3  ;;  %1375 = vst.msk [vmem:[#allocation3 + $0x40] sm:$0xff] %vm1373_vm6, %v1370_v10  ;;  %4912 = vmatprep.subr.bf16.mxu0 %v5015_v41  ;;  %v3536_v45 = vsel %vm5244_vm15, %v3531_v29, %v3535_v7  ;;  %v2912_v55 = vor.u32 %v2911_v36, %v2908_v39  ;;  %v5037_v7 = vld [vmem:[%s6170_s3 + $0x150] sm:$0xff]   ;;  %v5046_v41 = vld [vmem:[%s6170_s3 + $0x1b8] sm:$0xff]   ;;  %v5047_v13 = vld [vmem:[%s6170_s3 + $0x160] sm:$0xff]   ;;  %vm4557_vm1 = vcmask 130112  }
 0x1c0   :  { %v3594_v30 = vcombine.low %v5936_v22, %v3536_v45  ;;  %v5027_v22 = vld [vmem:[%s6170_s3 + $0x1e0] sm:$0xff]   ;;  %v3586_v44 = vor.u32 %v3585_v34, %v3582_v59  ;;  %v3591_v43 = vrot.slane %v3589_v58, 7  ;;  %v3610_v26 = vcombine.low %v5995_v46, %v6000_v61  ;;  %v5033_v46 = vld [vmem:[%s6170_s3 + $0x1e8] sm:$0xff]   ;;  %v5044_v33 = vld [vmem:[%s6170_s3 + $0x118] sm:$0xff]  }
 0x1c1   :  { %v2935_v6 = vcombine.low %v2927_v19, %v2934_v23  ;;  %v2913_v40 = vrot.slane %v2912_v55, 2  ;;  %v2944_v9 = vrot.slane %v2936_v12, %v5239_v3  ;;  %v5049_v39 = vld [vmem:[%s6170_s3 + $0x168] sm:$0xff]   ;;  %v5052_v37 = vld [vmem:[%s6170_s3 + $0x130] sm:$0xff]   ;;  %v5054_v58 = vld [vmem:[%s6170_s3 + $0x138] sm:$0xff]   ;;  %vm4568_vm9 = vcmask 1041409  }
 0x1c2   :  { %4913 = vmatpush3.bf16.msra.mxu0 %v5016_v52  ;;  %v3608_v54 = vrot.slane %v3594_v30, %v5239_v3  ;;  %v3587_v20 = vrot.slane %v3586_v44, 2  ;;  %v3618_v0 = vrot.slane %v3610_v26, %v5239_v3  ;;  %v5050_v10 = vld [vmem:[%s6170_s3 + $0x128] sm:$0xff]   ;;  %v5051_v52 = vld [vmem:[%s6170_s3 + $0x170] sm:$0xff]   ;;  %vm4571_vm10 = vcmask 123904  }
 0x1c3   :  { %2955 = vst.msk [vmem:[#allocation3 + $0x28] sm:$0xff] %vm124_vm0, %v2935_v6  ;;  %4914 = vmatprep.subr.bf16.mxu0 %v5021_v31  ;;  %v2918_v35 = vsel %vm5244_vm15, %v2913_v40, %v2917_v2  ;;  %v5053_v31 = vld [vmem:[%s6170_s3 + $0x178] sm:$0xff]   ;;  %vm4583_vm11 = vcmask 1024  }
 0x1c4   :  { %v3609_v15 = vcombine.low %v3601_v38, %v3608_v54  ;;  %v2937_v28 = vcombine.low %v5982_v51, %v2918_v35  ;;  %v3592_v51 = vsel %vm5244_vm15, %v3587_v20, %v3591_v43 }
 0x1c5   :  { %v3611_v47 = vcombine.low %v6014_v16, %v3592_v51  ;;  %v5031_v16 = vld [vmem:[%s6170_s3 + $0x148] sm:$0xff]  }
 0x1c6   :  { %v1368_v60 = vpop.permute.xlu0 %1367  ;;  %4915 = vmatpush3.bf16.msra.mxu0 %v5022_v32  ;;  %3629 = vst.msk [vmem:[#allocation3 + $0x38] sm:$0xff] %vm124_vm0, %v3609_v15  ;;  %v2951_v61 = vrot.slane %v2937_v28, %v5239_v3  ;;  %v3793_v63 = vld [vmem:[#allocation3 + $0x40] sm:$0xff] }
 0x1c7   :  { %1374 = vst.msk [vmem:[#allocation3] sm:$0xff] %vm1373_vm6, %v1368_v60  ;;  %4916 = vmatprep.subr.bf16.mxu0 %v5027_v22  ;;  %v3625_v27 = vrot.slane %v3611_v47, %v5239_v3  ;;  %v5040_v3 = vld [vmem:[%s6170_s3 + $0x1b0] sm:$0xff]   ;;  %v4746_v28 = vld [vmem:[%s6171_s4] ss:$0 sm:$0xff] }
 0x1c8   :  { %v2952_v19 = vcombine.low %v2944_v9, %v2951_v61 }
 0x1c9   :  { %v3626_v42 = vcombine.low %v3618_v0, %v3625_v27 }
 0x1ca   :  { %4917 = vmatpush3.bf16.msra.mxu0 %v5028_v53  ;;  %2956 = vst.msk [vmem:[#allocation3 + $0x68] sm:$0xff] %vm124_vm0, %v2952_v19 }
 0x1cb   :  { %4918 = vmatprep.subr.bf16.mxu0 %v5033_v46  ;;  %3630 = vst.msk [vmem:[#allocation3 + $0x78] sm:$0xff] %vm124_vm0, %v3626_v42 }
 0x1ce   :  { %v3785_v56 = vld [vmem:[#allocation3] sm:$0xff]  ;;  %4919 = vmatpush3.bf16.msra.mxu0 %v5034_v14 }
 0x1cf   :  { %4353 = vmatmul.mubr.bf16.vlgmr.msra.gmra.mrb[0].mxu1 %v3785_v56  ;;  %4920 = vmatprep.subr.bf16.mxu0 %v5039_v4 }
 0x1d0   :  { %4881 = vmatpush3.bf16.msra.mxu1 %v5026_v24 }
 0x1d1   :  { %4882 = vmatprep.subr.bf16.mxu1 %v5031_v16  ;;  %v2050_v21 = vpop.permute.xlu1 %2049  ;;  %v1762_v18 = vpop.permute.xlu0 %1761 }
 0x1d2   :  { %2054 = vst.msk [vmem:[#allocation3 + $0x50] sm:$0xff] %vm1373_vm6, %v2050_v21  ;;  %1766 = vst.msk [vmem:[#allocation3 + $0x48] sm:$0xff] %vm1373_vm6, %v1762_v18  ;;  %4921 = vmatpush3.bf16.msra.mxu0 %v5040_v3 }
 0x1d3   :  { %4922 = vmatprep.subr.bf16.mxu0 %v5045_v49 }
 0x1d4   :  { %4883 = vmatpush3.bf16.msra.mxu1 %v5032_v17 }
 0x1d5   :  { %4884 = vmatprep.subr.bf16.mxu1 %v5037_v7 }
 0x1d6   :  { %4923 = vmatpush3.bf16.msra.mxu0 %v5046_v41 }
 0x1d8   :  { %4885 = vmatpush3.bf16.msra.mxu1 %v5038_v57 }
 0x1d9   :  { %4886 = vmatprep.subr.bf16.mxu1 %v5043_v11  ;;  %v2720_v8 = vpop.permute.xlu1 %2719  ;;  %v3794_v50 = vld [vmem:[#allocation3 + $0x48] sm:$0xff]  ;;  %v3795_v36 = vld [vmem:[#allocation3 + $0x50] sm:$0xff] }
 0x1da   :  { %2725 = vst.msk [vmem:[#allocation3 + $0x20] sm:$0xff] %vm1373_vm6, %v2720_v8  ;;  %v2434_v62 = vpop.permute.xlu0 %2433  ;;  %4360 = vmatprep.mubr.bf16.mxu1 %v3794_v50 }
 0x1db   :  { %2438 = vst.msk [vmem:[#allocation3 + $0x58] sm:$0xff] %vm1373_vm6, %v2434_v62  ;;  %4361 = vmatmul.mubr.bf16.gmra.mrb[4].mxu1 %v3793_v63 }
 0x1dc   :  { %4887 = vmatpush3.bf16.msra.mxu1 %v5044_v33 }
 0x1dd   :  { %v3394_v29 = vpop.permute.xlu1 %3393  ;;  %4888 = vmatprep.subr.bf16.mxu1 %v5047_v13 }
 0x1de   :  { %3399 = vst.msk [vmem:[#allocation3 + $0x30] sm:$0xff] %vm1373_vm6, %v3394_v29 }
 0x1df   :  { %v3104_v5 = vpop.permute.xlu0 %3103 }
 0x1e0   :  { %3109 = vst.msk [vmem:[#allocation3 + $0x28] sm:$0xff] %vm1373_vm6, %v3104_v5  ;;  %4889 = vmatpush3.bf16.msra.mxu1 %v5048_v1 }
 0x1e1   :  { %4890 = vmatprep.subr.bf16.mxu1 %v5049_v39  ;;  %v3789_v12 = vld [vmem:[#allocation3 + $0x20] sm:$0xff] }
 0x1e2   :  { %v3796_v23 = vld [vmem:[#allocation3 + $0x58] sm:$0xff] }
 0x1e3   :  { %v3778_v38 = vpop.permute.xlu0 %3777  ;;  %4409 = vmatprep.mubr.bf16.mxu0 %v3796_v23 }
 0x1e4   :  { %3783 = vst.msk [vmem:[#allocation3 + $0x38] sm:$0xff] %vm1373_vm6, %v3778_v38  ;;  %4410 = vmatmul.mubr.bf16.gmra.mrb[20].mxu0 %v3795_v36  ;;  %4891 = vmatpush3.bf16.msra.mxu1 %v5050_v10 }
 0x1e5   :  { %4892 = vmatprep.subr.bf16.mxu1 %v5051_v52  ;;  %v3791_v59 = vld [vmem:[#allocation3 + $0x30] sm:$0xff] }
 0x1e6   :  { %v2722_v45 = vpop.permute.xlu1 %2721 }
 0x1e7   :  { %2726 = vst.msk [vmem:[#allocation3 + $0x60] sm:$0xff] %vm1373_vm6, %v2722_v45  ;;  %v3106_v2 = vpop.permute.xlu0 %3105  ;;  %v3790_v48 = vld [vmem:[#allocation3 + $0x28] sm:$0xff] }
 0x1e8   :  { %3110 = vst.msk [vmem:[#allocation3 + $0x68] sm:$0xff] %vm1373_vm6, %v3106_v2  ;;  %4450 = vmatprep.mubr.bf16.mxu1 %v3790_v48  ;;  %4893 = vmatpush3.bf16.msra.mxu1 %v5052_v37 }
 0x1e9   :  { %4894 = vmatprep.subr.bf16.mxu1 %v5053_v31 }
 0x1ea   :  { %v3396_v6 = vpop.permute.xlu1 %3395 }
 0x1eb   :  { %3400 = vst.msk [vmem:[#allocation3 + $0x70] sm:$0xff] %vm1373_vm6, %v3396_v6  ;;  %v3780_v30 = vpop.permute.xlu0 %3779  ;;  %v3792_v55 = vld [vmem:[#allocation3 + $0x38] sm:$0xff] }
 0x1ec   :  { %3784 = vst.msk [vmem:[#allocation3 + $0x78] sm:$0xff] %vm1373_vm6, %v3780_v30  ;;  %4499 = vmatprep.mubr.bf16.mxu0 %v3792_v55  ;;  %4895 = vmatpush3.bf16.msra.mxu1 %v5054_v58  ;;  %v4528_v30 = vld [vmem:[%s6172_s5] sm:$0xff] }
 0x1ed   :  { %4500 = vmatmul.mubr.bf16.vlgmr.msra.gmra.mrb[24].mxu0 %v3791_v59 }
 0x1ee   :  { %v3797_v40 = vld [vmem:[#allocation3 + $0x60] sm:$0xff] }
 0x1ef   :  { %4451 = vmatmul.mubr.bf16.vlgmr.msra.gmra.mrb[8].mxu1 %v3789_v12  ;;  %v3798_v34 = vld [vmem:[#allocation3 + $0x68] sm:$0xff] }
 0x1f0   :  { %4458 = vmatprep.mubr.bf16.mxu1 %v3798_v34 }
 0x1f2   :  { %v3799_v54 = vld [vmem:[#allocation3 + $0x70] sm:$0xff] }
 0x1f3   :  { %v3800_v32 = vld [vmem:[#allocation3 + $0x78] sm:$0xff] }
 0x1f4   :  { %4507 = vmatprep.mubr.bf16.mxu0 %v3800_v32 }
 0x1f5   :  { %4508 = vmatmul.mubr.bf16.gmra.mrb[28].mxu0 %v3799_v54 }
 0x1f7   :  { %4459 = vmatmul.mubr.bf16.gmra.mrb[12].mxu1 %v3797_v40 }
 0x28c   :  { %v4868_v22 = vpop.f32.mrb[16].mxu0 }
 0x28d   :  { %v4869_v44 = vpop.f32.mrb[17].mxu0 }
 0x28e   :  { %v4870_v43 = vadd.f32 %v4869_v44, %v4868_v22  ;;  %v4871_v15 = vpop.f32.mrb[18].mxu0 }
 0x28f   :  { %v4872_v35 = vpop.f32.mrb[19].mxu0 }
 0x290   :  { %v4873_v26 = vadd.f32 %v4872_v35, %v4871_v15 }
 0x2a2   :  { %v4840_v60 = vpop.f32.mrb[0].mxu1 }
 0x2a3   :  { %v4841_v9 = vpop.f32.mrb[1].mxu1 }
 0x2a4   :  { %v4842_v20 = vadd.f32 %v4841_v9, %v4840_v60  ;;  %v4843_v53 = vpop.f32.mrb[2].mxu1 }
 0x2a5   :  { %v4844_v46 = vpop.f32.mrb[3].mxu1 }
 0x2a6   :  { %v4355_v61 = vadd.f32 %v4842_v20, %v4746_v28  ;;  %v4845_v51 = vadd.f32 %v4844_v46, %v4843_v53 }
 0x2a8   :  { %v4358_v47 = vadd.f32 %v4845_v51, %v4746_v28  ;;  %v4404_v0 = vadd.f32 %v4870_v43, %v4355_v61  ;;  %v4529_v43 = vld [vmem:[%s6172_s5 + $0x8] sm:$0xff] }
 0x2aa   :  { %v4407_v19 = vadd.f32 %v4873_v26, %v4358_v47 }
 0x2ae   :  { %v4846_v14 = vpop.f32.mrb[4].mxu1 }
 0x2af   :  { %v4847_v27 = vpop.f32.mrb[5].mxu1 }
 0x2b0   :  { %v4848_v24 = vadd.f32 %v4847_v27, %v4846_v14  ;;  %v4849_v4 = vpop.f32.mrb[6].mxu1  ;;  %v6190_v14 = vlaneseq }
 0x2b1   :  { %v4850_v16 = vpop.f32.mrb[7].mxu1 }
 0x2b2   :  { %v4851_v42 = vadd.f32 %v4850_v16, %v4849_v4  ;;  %v4363_v56 = vadd.f32 %v4848_v24, %v4746_v28  ;;  %v4547_v27 = vand.u32 127, %v6190_v14 }
 0x2b4   :  { %v4366_v7 = vadd.f32 %v4851_v42, %v4746_v28  ;;  %v4552_v24 = vadd.s32 4294967288, %v4547_v27 }
 0x2b6   :  { %v4555_v16 = vsub.s32 %v4552_v24, %v5200_v25 }
 0x2b7   :  { %v4874_v3 = vpop.f32.mrb[20].mxu0 }
 0x2b8   :  { %v4875_v17 = vpop.f32.mrb[21].mxu0 }
 0x2b9   :  { %v4876_v49 = vadd.f32 %v4875_v17, %v4874_v3  ;;  %v4877_v21 = vpop.f32.mrb[22].mxu0  ;;  %v4550_v3 = vsub.s32 %v4547_v27, %v5200_v25 }
 0x2ba   :  { %v4878_v18 = vpop.f32.mrb[23].mxu0 }
 0x2bb   :  { %v4412_v41 = vadd.f32 %v4876_v49, %v4363_v56  ;;  %v4879_v57 = vadd.f32 %v4878_v18, %v4877_v21 }
 0x2bd   :  { %v4415_v11 = vadd.f32 %v4879_v57, %v4366_v7 }
 0x2c0   :  { %v4924_v33 = vpop.f32.mrb[24].mxu0 }
 0x2c1   :  { %v4925_v8 = vpop.f32.mrb[25].mxu0 }
 0x2c2   :  { %v4926_v50 = vadd.f32 %v4925_v8, %v4924_v33  ;;  %v4927_v13 = vpop.f32.mrb[26].mxu0  ;;  %v4896_v62 = vpop.f32.mrb[8].mxu1 }
 0x2c3   :  { %v4928_v63 = vpop.f32.mrb[27].mxu0  ;;  %v4897_v1 = vpop.f32.mrb[9].mxu1 }
 0x2c4   :  { %v4929_v29 = vadd.f32 %v4928_v63, %v4927_v13  ;;  %v4898_v39 = vadd.f32 %v4897_v1, %v4896_v62  ;;  %v4899_v5 = vpop.f32.mrb[10].mxu1 }
 0x2c5   :  { %v4900_v10 = vpop.f32.mrb[11].mxu1 }
 0x2c6   :  { %v4453_v52 = vadd.f32 %v4898_v39, %v4404_v0  ;;  %v4901_v23 = vadd.f32 %v4900_v10, %v4899_v5 }
 0x2c8   :  { %v4930_v38 = vpop.f32.mrb[28].mxu0  ;;  %v4502_v36 = vadd.f32 %v4926_v50, %v4453_v52  ;;  %v4456_v37 = vadd.f32 %v4901_v23, %v4407_v19  ;;  %v12_v19 = vstv %s6173_s6 }
 0x2c9   :  { %v4931_v31 = vpop.f32.mrb[29].mxu0  ;;  %13 = vst [vmem:[#allocation4] sm:$0x1] %v12_v19 }
 0x2ca   :  { %v4932_v45 = vadd.f32 %v4931_v31, %v4930_v38  ;;  %v4933_v2 = vpop.f32.mrb[30].mxu0  ;;  %v4505_v48 = vadd.f32 %v4929_v29, %v4456_v37  ;;  %v4902_v58 = vpop.f32.mrb[12].mxu1  ;;  %vm4516_vm0 = vcmp.gt.f32.partialorder %v4502_v36, 0.0  ;;  %v4520_v6 = vmul.f32 0.2, %v4502_v36 }
 0x2cb   :  { %v4934_v55 = vpop.f32.mrb[31].mxu0  ;;  %v4903_v59 = vpop.f32.mrb[13].mxu1 }
 0x2cc   :  { %v4935_v12 = vadd.f32 %v4934_v55, %v4933_v2  ;;  %v4904_v34 = vadd.f32 %v4903_v59, %v4902_v58  ;;  %v4905_v32 = vpop.f32.mrb[14].mxu1  ;;  %v4524_v54 = vsel %vm4516_vm0, %v4502_v36, %v4520_v6  ;;  %vm4517_vm15 = vcmp.gt.f32.partialorder %v4505_v48, 0.0 }
 0x2cd   :  { %v4906_v40 = vpop.f32.mrb[15].mxu1  ;;  %v4530_v22 = vmul.f32 %v4528_v30, %v4524_v54  ;;  %v4521_v44 = vmul.f32 0.2, %v4505_v48 }
 0x2ce   :  { %v4461_v15 = vadd.f32 %v4904_v34, %v4412_v41  ;;  %v4907_v35 = vadd.f32 %v4906_v40, %v4905_v32 }
 0x2cf   :  { %4534 = vadd.xlane.f32.xlu0 %v4530_v22  ;;  %v4525_v26 = vsel %vm4517_vm15, %v4505_v48, %v4521_v44 }
 0x2d0   :  { %v4510_v60 = vadd.f32 %v4932_v45, %v4461_v15  ;;  %v4464_v28 = vadd.f32 %v4907_v35, %v4415_v11  ;;  %v4531_v9 = vmul.f32 %v4529_v43, %v4525_v26  ;;  %v4811_v8 = vld [vmem:[#allocation4] ss:$0 sm:$0xff] }
 0x2d2   :  { %v4513_v20 = vadd.f32 %v4935_v12, %v4464_v28  ;;  %4536 = vadd.xlane.f32.xlu1 %v4531_v9  ;;  %vm4518_vm7 = vcmp.gt.f32.partialorder %v4510_v60, 0.0  ;;  %v4522_v53 = vmul.f32 0.2, %v4510_v60 }
 0x2d4   :  { %v4526_v46 = vsel %vm4518_vm7, %v4510_v60, %v4522_v53  ;;  %vm4519_vm8 = vcmp.gt.f32.partialorder %v4513_v20, 0.0  ;;  %v4523_v61 = vmul.f32 0.2, %v4513_v20 }
 0x2d5   :  { %v4532_v51 = vmul.f32 %v4528_v30, %v4526_v46 }
 0x2d6   :  { %v4527_v47 = vsel %vm4519_vm8, %v4513_v20, %v4523_v61 }
 0x2d7   :  { %4538 = vadd.xlane.f32.xlu0 %v4532_v51  ;;  %v4533_v0 = vmul.f32 %v4529_v43, %v4527_v47 }
 0x2db   :  { %4540 = vadd.xlane.f32.xlu0 %v4533_v0 }
 0x35c   :  { %v4535_v4 = vpop.xlane.xlu0 %4534 }
 0x35d   :  { %v4551_v7 = vrot.slane %v4535_v4, %v4550_v3 }
 0x35f   :  { %v4537_v42 = vpop.xlane.xlu1 %4536 }
 0x360   :  { %v4556_v17 = vrot.slane %v4537_v42, %v4555_v16 }
 0x362   :  { %v4558_v41 = vsel %vm4557_vm1, %v4556_v17, %v4551_v7 }
 0x364   :  { %v4539_v56 = vpop.xlane.xlu0 %4538 }
 0x365   :  { %v4562_v21 = vrot.slane %v4539_v56, %v4550_v3 }
 0x368   :  { %v4541_v49 = vpop.xlane.xlu0 %4540 }
 0x369   :  { %v4566_v18 = vrot.slane %v4541_v49, %v4555_v16 }
 0x36b   :  { %v4567_v57 = vsel %vm4557_vm1, %v4566_v18, %v4562_v21 }
 0x36c   :  { %v4569_v11 = vsel %vm4568_vm9, %v4567_v57, %v4558_v41 }
 0x36d   :  { %v4572_v33 = vsel %vm4571_vm10, %v4569_v11, 0.0 }
 0x36e   :  { %4573 = vadd.xlane.f32.xlu1 %v4572_v33 }
 0x3fb   :  { %v4574_v50 = vpop.xlane.xlu1 %4573 }
 0x3fc   :  { %v4582_v13 = vadd.f32 %v4811_v8, %v4574_v50 }
 0x3fe   :  { %4584 = vst.msk [vmem:[%s6174_s7] sm:$0x3] %vm4583_vm11, %v4582_v13 }

</bundles_post_ra>
